<compile_context>
chip_gen: v6e
topology: v6e:2x2x1
jax: 0.10.0
libtpu: 0.0.40
codegen_flags: <defaults>
</compile_context>

<pallas_src>
from functools import partial

import jax
import jax.numpy as jnp
from jax import lax
from jax.experimental import pallas as pl
from jax.experimental.pallas import tpu as pltpu

LN_EPS = 1e-5      # nn.LayerNorm default eps
POOL_EPS = 1e-6    # PredictorLG.eps (added AFTER the division, as in the torch code)


def _gelu(x, approximate):
    if approximate:
        # tanh formulation -> EUP tanh slot (perf knob for v6e/v7x)
        c = 0.7978845608028654  # sqrt(2/pi)
        return 0.5 * x * (1.0 + jnp.tanh(c * (x + 0.044715 * x * x * x)))
    # torch.nn.GELU default: exact erf formulation (f32, VALU)
    return 0.5 * x * (1.0 + lax.erf(x * 0.7071067811865476))


def _softplus(t):
    # numerically stable softplus
    return jnp.maximum(t, 0.0) + jnp.log(1.0 + jnp.exp(-jnp.abs(t)))


def _predictor_kernel(x_ref, pol_ref,
                      g_ref, be_ref,
                      w1lo_ref, w1hi_ref, b1lo_ref, b1hi_ref,
                      w2lo_ref, w2hi_ref, b2_ref,
                      w3_ref, b3_ref,
                      d_ref, bd_ref,
                      o_ref, *, approx_gelu):
    bblk, n, c = x_ref.shape
    ch = c // 2
    m = bblk * n

    # x arrives in bf16 (HBM bytes halved); LayerNorm stats in f32.
    x = x_ref[...].astype(jnp.float32).reshape(m, c)

    # ---- in_conv: LayerNorm -------------------------------------------------
    mean = jnp.mean(x, axis=-1, keepdims=True)
    var = jnp.mean(jnp.square(x - mean), axis=-1, keepdims=True)
    xn = (x - mean) * lax.rsqrt(var + LN_EPS)
    # fold scale/shift and cast; the f32 xn dies here (no extra live buffer)
    xn_b = (xn * g_ref[...] + be_ref[...]).astype(jnp.bfloat16)

    # ---- in_conv: Linear(C, C) split into lane-aligned halves + GELU --------
    h_lo = _gelu(jnp.dot(xn_b, w1lo_ref[...],
                         preferred_element_type=jnp.float32) + b1lo_ref[...],
                 approx_gelu)
    h_hi = _gelu(jnp.dot(xn_b, w1hi_ref[...],
                         preferred_element_type=jnp.float32) + b1hi_ref[...],
                 approx_gelu)

    # ---- policy-weighted global pooling: VPU mul + sublane reduce -----------
    pol = pol_ref[...]                                   # (bblk, n, 1) f32
    h_hi3 = h_hi.reshape(bblk, n, ch)
    num = jnp.sum(h_hi3 * pol, axis=1)                   # (bblk, ch)
    den = jnp.sum(pol, axis=1)                           # (bblk, 1)
    # NOTE: eps added after the division, matching PyTorch (den==0 -> inf).
    global_x = num * pl.reciprocal(den, approx=False) + POOL_EPS   # (bblk, ch)

    # ---- out_conv Linear #1: dense local half + per-batch rank-1 term -------
    h2_loc = jnp.dot(h_lo.astype(jnp.bfloat16), w2lo_ref[...],
                     preferred_element_type=jnp.float32)            # (M, ch)
    g_term = jnp.dot(global_x.astype(jnp.bfloat16), w2hi_ref[...],
                     preferred_element_type=jnp.float32)            # (bblk, ch)
    h2 = _gelu(h2_loc.reshape(bblk, n, ch) + g_term[:, None, :] + b2_ref[...],
               approx_gelu)
    h2 = h2.reshape(m, ch)

    # ---- out_conv Linear #2 + GELU -------------------------------------------
    h3 = _gelu(jnp.dot(h2.astype(jnp.bfloat16), w3_ref[...],
                       preferred_element_type=jnp.float32) + b3_ref[...],
               approx_gelu)                                          # (M, C/4)

    # ---- out_conv Linear #3 (width 2) + LogSoftmax, analytic 2-class form ----
    # d' = logit0 - logit1 = h3 @ (w4[:,0]-w4[:,1]) + (b4[0]-b4[1]); bf16 MXU.
    dprime = jnp.dot(h3.astype(jnp.bfloat16), d_ref[...],
                     preferred_element_type=jnp.float32) + bd_ref[...]   # (M, 1)
    sign = 2.0 * lax.broadcasted_iota(jnp.int32, (1, 2), 1).astype(jnp.float32) - 1.0
    out = -_softplus(dprime * sign)                       # (M, 2): [-sp(-d'), -sp(d')]
    o_ref[...] = out.reshape(bblk, n, 2)


def _pick_b_blk(batch, tokens, channels, *, x_itemsize=2,
                max_rows=2048, vmem_budget=40 * (1 << 20), min_split_rows=256):
    """Largest divisor of `batch` whose fused block fits the VMEM budget.

    Prefer >=2 grid steps (v7x megacore) only when each step keeps >=
    `min_split_rows` fused rows; otherwise a single step wins on 1-TC chips
    (full MXU rows, no extra grid-step overhead)."""
    def fits(bb):
        rows = bb * tokens
        if rows > max_rows:
            return False
        est = (2 * rows * channels * x_itemsize          # x block, double-buffered
               + 2 * rows * 512                           # policy block (lane-padded)
               + 2 * int(3.25 * channels * channels)      # bf16 weights, double-buffered
               + 6 * rows * channels * 4                  # live f32 intermediates
               + 2 * rows * 2 * 4 * 64)                   # output block (lane-padded)
        return est <= vmem_budget
    divisors = [d for d in range(1, batch + 1) if batch % d == 0 and fits(d)]
    if not divisors:
        return 1
    best = max(divisors)
    split = [d for d in divisors if d < batch and d * tokens >= min_split_rows]
    if best == batch and split:
        best = max(split)
    return best


def _const_spec(arr, pipeline_mode=None):
    nd = arr.ndim
    idx = lambda i, nd=nd: (0,) * nd
    if pipeline_mode is None:
        return pl.BlockSpec(arr.shape, idx)
    return pl.BlockSpec(arr.shape, idx, pipeline_mode=pipeline_mode)


def predictor_lg(x, policy, params, *, b_blk=None, approx_gelu=False,
                 x_dtype=jnp.bfloat16, single_buffer_weights=False):
    """x: (B, N, C) f32, policy: (B, N, 1) f32 -> (B, N, 2) f32 (log-probs)."""
    B, N, C = x.shape
    Ch, Cq = C // 2, C // 4
    gamma, beta, w1, b1, w2, b2, w3, b3, w4, b4 = params

    bf16, f32 = jnp.bfloat16, jnp.float32

    # Pad the token axis to a multiple of 8 (sublane) so the in-kernel
    # (b_blk, N, C) -> (M, C) fold is a free reshape (e.g. N=197 with CLS).
    Np = ((N + 7) // 8) * 8
    if Np != N:
        x = jnp.pad(x, ((0, 0), (0, Np - N), (0, 0)))
        policy = jnp.pad(policy, ((0, 0), (0, Np - N), (0, 0)))  # zero policy => ignored

    # Wrapper-side weight preprocessing (once): lane-aligned splits + bf16.
    w1_lo, w1_hi = w1[:, :Ch].astype(bf16), w1[:, Ch:].astype(bf16)
    b1_lo, b1_hi = b1[:, :Ch].astype(f32), b1[:, Ch:].astype(f32)
    w2_lo, w2_hi = w2[:Ch, :].astype(bf16), w2[Ch:, :].astype(bf16)
    w3_b = w3.astype(bf16)
    d_col = (w4[:, 0:1] - w4[:, 1:2]).astype(bf16)      # (Cq, 1) bf16 MXU operand
    b_diff = (b4[:, 0:1] - b4[:, 1:2]).astype(f32)      # (1, 1)

    x_in = x.astype(x_dtype)
    pol_in = policy.astype(f32)

    if b_blk is None:
        b_blk = _pick_b_blk(B, Np, C, x_itemsize=jnp.dtype(x_dtype).itemsize)
    assert B % b_blk == 0, "b_blk must divide the batch dimension"
    grid = (B // b_blk,)

    wspec = (lambda a: _const_spec(a, pl.Buffered(1))) if single_buffer_weights \
        else _const_spec

    in_specs = [
        pl.BlockSpec((b_blk, Np, C), lambda i: (i, 0, 0)),   # x (bf16)
        pl.BlockSpec((b_blk, Np, 1), lambda i: (i, 0, 0)),   # policy
        wspec(gamma), wspec(beta),
        wspec(w1_lo), wspec(w1_hi), wspec(b1_lo), wspec(b1_hi),
        wspec(w2_lo), wspec(w2_hi), wspec(b2),
        wspec(w3_b), wspec(b3),
        wspec(d_col), wspec(b_diff),
    ]

    out = pl.pallas_call(
        partial(_predictor_kernel, approx_gelu=approx_gelu),
        out_shape=jax.ShapeDtypeStruct((B, Np, 2), jnp.float32),
        grid=grid,
        in_specs=in_specs,
        out_specs=pl.BlockSpec((b_blk, Np, 2), lambda i: (i, 0, 0)),
        compiler_params=pltpu.CompilerParams(
            dimension_semantics=("parallel",),
            vmem_limit_bytes=48 * 1024 * 1024),
    )(x_in, pol_in, gamma, beta,
      w1_lo, w1_hi, b1_lo, b1_hi,
      w2_lo, w2_hi, b2,
      w3_b, b3, d_col, b_diff)

    if Np != N:
        out = out[:, :N, :]
    return out


def init_params(key, embed_dim):
    """Deterministic synthetic parameters matching PredictorLG.__init__ shapes."""
    C = embed_dim
    ks = jax.random.split(key, 8)
    scale = 0.02
    gamma = jnp.ones((1, C), jnp.float32)
    beta = jnp.zeros((1, C), jnp.float32)
    w1 = scale * jax.random.normal(ks[0], (C, C), jnp.float32)
    b1 = scale * jax.random.normal(ks[1], (1, C), jnp.float32)
    w2 = scale * jax.random.normal(ks[2], (C, C // 2), jnp.float32)
    b2 = scale * jax.random.normal(ks[3], (1, C // 2), jnp.float32)
    w3 = scale * jax.random.normal(ks[4], (C // 2, C // 4), jnp.float32)
    b3 = scale * jax.random.normal(ks[5], (1, C // 4), jnp.float32)
    w4 = scale * jax.random.normal(ks[6], (C // 4, 2), jnp.float32)
    b4 = scale * jax.random.normal(ks[7], (1, 2), jnp.float32)
    return (gamma, beta, w1, b1, w2, b2, w3, b3, w4, b4)


def predictor_lg_ref(x, policy, params):
    """Pure-JAX f32 reference mirroring the PyTorch forward (for validation)."""
    gamma, beta, w1, b1, w2, b2, w3, b3, w4, b4 = params
    mean = jnp.mean(x, axis=-1, keepdims=True)
    var = jnp.mean(jnp.square(x - mean), axis=-1, keepdims=True)
    xn = (x - mean) / jnp.sqrt(var + LN_EPS) * gamma[0] + beta[0]
    h = _gelu(xn @ w1 + b1[0], False)
    B, N, C = h.shape
    local_x = h[:, :, : C // 2]
    global_x = jnp.sum(h[:, :, C // 2:] * policy, axis=1, keepdims=True) / \
        jnp.sum(policy, axis=1, keepdims=True) + POOL_EPS
    feat = jnp.concatenate(
        [local_x, jnp.broadcast_to(global_x, (B, N, C // 2))], axis=-1)
    h2 = _gelu(feat @ w2 + b2[0], False)
    h3 = _gelu(h2 @ w3 + b3[0], False)
    logits = h3 @ w4 + b4[0]
    return jax.nn.log_softmax(logits, axis=-1)


if __name__ == "__main__":
    B, N, C = 8, 16, 128   # small shapes: batch=8, tokens=16, embed_dim=128

    key = jax.random.PRNGKey(0)
    kx, kp, kw = jax.random.split(key, 3)
    x = jax.random.normal(kx, (B, N, C), jnp.float32)
    # policy in {0, 1} like DyViT token keep-masks, shape (B, N, 1)
    policy = (jax.random.uniform(kp, (B, N, 1)) > 0.3).astype(jnp.float32)
    params = init_params(kw, C)

    ref = predictor_lg_ref(x, policy, params)

    # Default path: exact-erf GELU (torch semantics), bf16 x + bf16 MXU operands.
    out = jax.block_until_ready(predictor_lg(x, policy, params))
    assert out.shape == (B, N, 2)
    assert jnp.allclose(out, ref, atol=1e-2, rtol=1e-2), "mismatch vs JAX reference"

    # Perf-review path: tanh-approx GELU on the EUP (recommended for v6e/v7x).
    out_approx = jax.block_until_ready(
        predictor_lg(x, policy, params, approx_gelu=True))
    assert jnp.allclose(out_approx, ref, atol=2e-2, rtol=2e-2), \
        "mismatch vs JAX reference (approx GELU)"

    print("KERNEL_OK")
</pallas_src>

<mosaic_0001>
module attributes {stable_mosaic.version = 11 : i64} {
  func.func @_predictor_kernel(%arg0: i32, %arg1: memref<8x16x128xbf16, #tpu.memory_space<vmem>>, %arg2: memref<8x16x1xf32, #tpu.memory_space<vmem>>, %arg3: memref<1x128xf32, #tpu.memory_space<vmem>>, %arg4: memref<1x128xf32, #tpu.memory_space<vmem>>, %arg5: memref<128x64xbf16, #tpu.memory_space<vmem>>, %arg6: memref<128x64xbf16, #tpu.memory_space<vmem>>, %arg7: memref<1x64xf32, #tpu.memory_space<vmem>>, %arg8: memref<1x64xf32, #tpu.memory_space<vmem>>, %arg9: memref<64x64xbf16, #tpu.memory_space<vmem>>, %arg10: memref<64x64xbf16, #tpu.memory_space<vmem>>, %arg11: memref<1x64xf32, #tpu.memory_space<vmem>>, %arg12: memref<64x32xbf16, #tpu.memory_space<vmem>>, %arg13: memref<1x32xf32, #tpu.memory_space<vmem>>, %arg14: memref<32x1xbf16, #tpu.memory_space<vmem>>, %arg15: memref<1x1xf32, #tpu.memory_space<vmem>>, %arg16: memref<8x16x2xf32, #tpu.memory_space<vmem>>) attributes {dimension_semantics = [#tpu.dimension_semantics<parallel>], iteration_bounds = array<i64: 1>, scalar_prefetch = 0 : i64, scratch_operands = 0 : i64, tpu.core_type = #tpu.core_type<tc>, window_params = [{transform_indices = @transform_0, window_bounds = array<i64: 8, 16, 128>}, {transform_indices = @transform_1, window_bounds = array<i64: 8, 16, 1>}, {pipeline_mode = #tpu.pipeline_mode<synchronous>, transform_indices = @transform_2, window_bounds = array<i64: 1, 128>}, {pipeline_mode = #tpu.pipeline_mode<synchronous>, transform_indices = @transform_3, window_bounds = array<i64: 1, 128>}, {pipeline_mode = #tpu.pipeline_mode<synchronous>, transform_indices = @transform_4, window_bounds = array<i64: 128, 64>}, {pipeline_mode = #tpu.pipeline_mode<synchronous>, transform_indices = @transform_5, window_bounds = array<i64: 128, 64>}, {pipeline_mode = #tpu.pipeline_mode<synchronous>, transform_indices = @transform_6, window_bounds = array<i64: 1, 64>}, {pipeline_mode = #tpu.pipeline_mode<synchronous>, transform_indices = @transform_7, window_bounds = array<i64: 1, 64>}, {pipeline_mode = #tpu.pipeline_mode<synchronous>, transform_indices = @transform_8, window_bounds = array<i64: 64, 64>}, {pipeline_mode = #tpu.pipeline_mode<synchronous>, transform_indices = @transform_9, window_bounds = array<i64: 64, 64>}, {pipeline_mode = #tpu.pipeline_mode<synchronous>, transform_indices = @transform_10, window_bounds = array<i64: 1, 64>}, {pipeline_mode = #tpu.pipeline_mode<synchronous>, transform_indices = @transform_11, window_bounds = array<i64: 64, 32>}, {pipeline_mode = #tpu.pipeline_mode<synchronous>, transform_indices = @transform_12, window_bounds = array<i64: 1, 32>}, {pipeline_mode = #tpu.pipeline_mode<synchronous>, transform_indices = @transform_13, window_bounds = array<i64: 32, 1>}, {pipeline_mode = #tpu.pipeline_mode<synchronous>, transform_indices = @transform_14, window_bounds = array<i64: 1, 1>}, {transform_indices = @transform_15, window_bounds = array<i64: 8, 16, 2>}]} {
    %c0 = arith.constant 0 : index
    %c0_0 = arith.constant 0 : index
    %c0_1 = arith.constant 0 : index
    %0 = vector.load %arg1[%c0, %c0_0, %c0_1] : memref<8x16x128xbf16, #tpu.memory_space<vmem>>, vector<8x16x128xbf16>
    %1 = arith.extf %0 : vector<8x16x128xbf16> to vector<8x16x128xf32>
    %2 = vector.shape_cast %1 : vector<8x16x128xf32> to vector<128x128xf32>
    %cst = arith.constant dense<0.000000e+00> : vector<128xf32>
    %3 = vector.multi_reduction <add>, %2, %cst [1] : vector<128x128xf32> to vector<128xf32>
    %4 = vector.shape_cast %3 : vector<128xf32> to vector<128x1xf32>
    %cst_2 = arith.constant 1.280000e+02 : f32
    %5 = vector.broadcast %cst_2 : f32 to vector<128x1xf32>
    %6 = arith.divf %4, %5 : vector<128x1xf32>
    %7 = vector.broadcast %6 : vector<128x1xf32> to vector<128x128xf32>
    %8 = arith.subf %2, %7 : vector<128x128xf32>
    %9 = arith.mulf %8, %8 : vector<128x128xf32>
    %cst_3 = arith.constant dense<0.000000e+00> : vector<128xf32>
    %10 = vector.multi_reduction <add>, %9, %cst_3 [1] : vector<128x128xf32> to vector<128xf32>
    %11 = vector.shape_cast %10 : vector<128xf32> to vector<128x1xf32>
    %cst_4 = arith.constant 1.280000e+02 : f32
    %12 = vector.broadcast %cst_4 : f32 to vector<128x1xf32>
    %13 = arith.divf %11, %12 : vector<128x1xf32>
    %14 = vector.broadcast %6 : vector<128x1xf32> to vector<128x128xf32>
    %15 = arith.subf %2, %14 : vector<128x128xf32>
    %cst_5 = arith.constant 9.99999974E-6 : f32
    %16 = vector.broadcast %cst_5 : f32 to vector<128x1xf32>
    %17 = arith.addf %13, %16 : vector<128x1xf32>
    %18 = math.rsqrt %17 : vector<128x1xf32>
    %19 = vector.broadcast %18 : vector<128x1xf32> to vector<128x128xf32>
    %20 = arith.mulf %15, %19 : vector<128x128xf32>
    %c0_6 = arith.constant 0 : index
    %c0_7 = arith.constant 0 : index
    %21 = vector.load %arg3[%c0_6, %c0_7] : memref<1x128xf32, #tpu.memory_space<vmem>>, vector<1x128xf32>
    %22 = vector.broadcast %21 : vector<1x128xf32> to vector<128x128xf32>
    %23 = arith.mulf %20, %22 : vector<128x128xf32>
    %c0_8 = arith.constant 0 : index
    %c0_9 = arith.constant 0 : index
    %24 = vector.load %arg4[%c0_8, %c0_9] : memref<1x128xf32, #tpu.memory_space<vmem>>, vector<1x128xf32>
    %25 = vector.broadcast %24 : vector<1x128xf32> to vector<128x128xf32>
    %26 = arith.addf %23, %25 : vector<128x128xf32>
    %27 = arith.truncf %26 : vector<128x128xf32> to vector<128x128xbf16>
    %c0_10 = arith.constant 0 : index
    %c0_11 = arith.constant 0 : index
    %28 = vector.load %arg5[%c0_10, %c0_11] : memref<128x64xbf16, #tpu.memory_space<vmem>>, vector<128x64xbf16>
    %cst_12 = arith.constant dense<0.000000e+00> : vector<128x64xf32>
    %29 = tpu.matmul %27, %28, %cst_12 {dimension_numbers = #tpu.dot_dimension_numbers<[1], [0], [0], [1], [0, 0, 1, 1], [], []>} : vector<128x128xbf16>, vector<128x64xbf16>, vector<128x64xf32> -> vector<128x64xf32>
    %c0_13 = arith.constant 0 : index
    %c0_14 = arith.constant 0 : index
    %30 = vector.load %arg7[%c0_13, %c0_14] : memref<1x64xf32, #tpu.memory_space<vmem>>, vector<1x64xf32>
    %31 = vector.broadcast %30 : vector<1x64xf32> to vector<128x64xf32>
    %32 = arith.addf %29, %31 : vector<128x64xf32>
    %cst_15 = arith.constant 5.000000e-01 : f32
    %33 = vector.broadcast %cst_15 : f32 to vector<128x64xf32>
    %34 = arith.mulf %33, %32 : vector<128x64xf32>
    %cst_16 = arith.constant 0.707106769 : f32
    %35 = vector.broadcast %cst_16 : f32 to vector<128x64xf32>
    %36 = arith.mulf %32, %35 : vector<128x64xf32>
    %37 = math.erf %36 : vector<128x64xf32>
    %cst_17 = arith.constant 1.000000e+00 : f32
    %38 = vector.broadcast %cst_17 : f32 to vector<128x64xf32>
    %39 = arith.addf %38, %37 : vector<128x64xf32>
    %40 = arith.mulf %34, %39 : vector<128x64xf32>
    %c0_18 = arith.constant 0 : index
    %c0_19 = arith.constant 0 : index
    %41 = vector.load %arg6[%c0_18, %c0_19] : memref<128x64xbf16, #tpu.memory_space<vmem>>, vector<128x64xbf16>
    %cst_20 = arith.constant dense<0.000000e+00> : vector<128x64xf32>
    %42 = tpu.matmul %27, %41, %cst_20 {dimension_numbers = #tpu.dot_dimension_numbers<[1], [0], [0], [1], [0, 0, 1, 1], [], []>} : vector<128x128xbf16>, vector<128x64xbf16>, vector<128x64xf32> -> vector<128x64xf32>
    %c0_21 = arith.constant 0 : index
    %c0_22 = arith.constant 0 : index
    %43 = vector.load %arg8[%c0_21, %c0_22] : memref<1x64xf32, #tpu.memory_space<vmem>>, vector<1x64xf32>
    %44 = vector.broadcast %43 : vector<1x64xf32> to vector<128x64xf32>
    %45 = arith.addf %42, %44 : vector<128x64xf32>
    %cst_23 = arith.constant 5.000000e-01 : f32
    %46 = vector.broadcast %cst_23 : f32 to vector<128x64xf32>
    %47 = arith.mulf %46, %45 : vector<128x64xf32>
    %cst_24 = arith.constant 0.707106769 : f32
    %48 = vector.broadcast %cst_24 : f32 to vector<128x64xf32>
    %49 = arith.mulf %45, %48 : vector<128x64xf32>
    %50 = math.erf %49 : vector<128x64xf32>
    %cst_25 = arith.constant 1.000000e+00 : f32
    %51 = vector.broadcast %cst_25 : f32 to vector<128x64xf32>
    %52 = arith.addf %51, %50 : vector<128x64xf32>
    %53 = arith.mulf %47, %52 : vector<128x64xf32>
    %c0_26 = arith.constant 0 : index
    %c0_27 = arith.constant 0 : index
    %c0_28 = arith.constant 0 : index
    %54 = vector.load %arg2[%c0_26, %c0_27, %c0_28] : memref<8x16x1xf32, #tpu.memory_space<vmem>>, vector<8x16x1xf32>
    %55 = vector.shape_cast %53 : vector<128x64xf32> to vector<8x16x64xf32>
    %56 = vector.broadcast %54 : vector<8x16x1xf32> to vector<8x16x64xf32>
    %57 = arith.mulf %55, %56 : vector<8x16x64xf32>
    %cst_29 = arith.constant dense<0.000000e+00> : vector<8x64xf32>
    %58 = vector.multi_reduction <add>, %57, %cst_29 [1] : vector<8x16x64xf32> to vector<8x64xf32>
    %cst_30 = arith.constant dense<0.000000e+00> : vector<8x1xf32>
    %59 = vector.multi_reduction <add>, %54, %cst_30 [1] : vector<8x16x1xf32> to vector<8x1xf32>
    %60 = tpu.reciprocal %59 : vector<8x1xf32> -> vector<8x1xf32>
    %61 = vector.broadcast %60 : vector<8x1xf32> to vector<8x64xf32>
    %62 = arith.mulf %58, %61 : vector<8x64xf32>
    %cst_31 = arith.constant 9.99999997E-7 : f32
    %63 = vector.broadcast %cst_31 : f32 to vector<8x64xf32>
    %64 = arith.addf %62, %63 : vector<8x64xf32>
    %65 = arith.truncf %40 : vector<128x64xf32> to vector<128x64xbf16>
    %c0_32 = arith.constant 0 : index
    %c0_33 = arith.constant 0 : index
    %66 = vector.load %arg9[%c0_32, %c0_33] : memref<64x64xbf16, #tpu.memory_space<vmem>>, vector<64x64xbf16>
    %cst_34 = arith.constant dense<0.000000e+00> : vector<128x64xf32>
    %67 = tpu.matmul %65, %66, %cst_34 {dimension_numbers = #tpu.dot_dimension_numbers<[1], [0], [0], [1], [0, 0, 1, 1], [], []>} : vector<128x64xbf16>, vector<64x64xbf16>, vector<128x64xf32> -> vector<128x64xf32>
    %68 = arith.truncf %64 : vector<8x64xf32> to vector<8x64xbf16>
    %c0_35 = arith.constant 0 : index
    %c0_36 = arith.constant 0 : index
    %69 = vector.load %arg10[%c0_35, %c0_36] : memref<64x64xbf16, #tpu.memory_space<vmem>>, vector<64x64xbf16>
    %cst_37 = arith.constant dense<0.000000e+00> : vector<8x64xf32>
    %70 = tpu.matmul %68, %69, %cst_37 {dimension_numbers = #tpu.dot_dimension_numbers<[1], [0], [0], [1], [0, 0, 1, 1], [], []>} : vector<8x64xbf16>, vector<64x64xbf16>, vector<8x64xf32> -> vector<8x64xf32>
    %71 = vector.shape_cast %67 : vector<128x64xf32> to vector<8x16x64xf32>
    %72 = vector.shape_cast %70 : vector<8x64xf32> to vector<8x1x64xf32>
    %73 = vector.broadcast %72 : vector<8x1x64xf32> to vector<8x16x64xf32>
    %74 = arith.addf %71, %73 : vector<8x16x64xf32>
    %c0_38 = arith.constant 0 : index
    %c0_39 = arith.constant 0 : index
    %75 = vector.load %arg11[%c0_38, %c0_39] : memref<1x64xf32, #tpu.memory_space<vmem>>, vector<1x64xf32>
    %76 = vector.shape_cast %75 : vector<1x64xf32> to vector<1x1x64xf32>
    %77 = vector.broadcast %76 : vector<1x1x64xf32> to vector<8x16x64xf32>
    %78 = arith.addf %74, %77 : vector<8x16x64xf32>
    %cst_40 = arith.constant 5.000000e-01 : f32
    %79 = vector.broadcast %cst_40 : f32 to vector<8x16x64xf32>
    %80 = arith.mulf %79, %78 : vector<8x16x64xf32>
    %cst_41 = arith.constant 0.707106769 : f32
    %81 = vector.broadcast %cst_41 : f32 to vector<8x16x64xf32>
    %82 = arith.mulf %78, %81 : vector<8x16x64xf32>
    %83 = math.erf %82 : vector<8x16x64xf32>
    %cst_42 = arith.constant 1.000000e+00 : f32
    %84 = vector.broadcast %cst_42 : f32 to vector<8x16x64xf32>
    %85 = arith.addf %84, %83 : vector<8x16x64xf32>
    %86 = arith.mulf %80, %85 : vector<8x16x64xf32>
    %87 = vector.shape_cast %86 : vector<8x16x64xf32> to vector<128x64xf32>
    %88 = arith.truncf %87 : vector<128x64xf32> to vector<128x64xbf16>
    %c0_43 = arith.constant 0 : index
    %c0_44 = arith.constant 0 : index
    %89 = vector.load %arg12[%c0_43, %c0_44] : memref<64x32xbf16, #tpu.memory_space<vmem>>, vector<64x32xbf16>
    %cst_45 = arith.constant dense<0.000000e+00> : vector<128x32xf32>
    %90 = tpu.matmul %88, %89, %cst_45 {dimension_numbers = #tpu.dot_dimension_numbers<[1], [0], [0], [1], [0, 0, 1, 1], [], []>} : vector<128x64xbf16>, vector<64x32xbf16>, vector<128x32xf32> -> vector<128x32xf32>
    %c0_46 = arith.constant 0 : index
    %c0_47 = arith.constant 0 : index
    %91 = vector.load %arg13[%c0_46, %c0_47] : memref<1x32xf32, #tpu.memory_space<vmem>>, vector<1x32xf32>
    %92 = vector.broadcast %91 : vector<1x32xf32> to vector<128x32xf32>
    %93 = arith.addf %90, %92 : vector<128x32xf32>
    %cst_48 = arith.constant 5.000000e-01 : f32
    %94 = vector.broadcast %cst_48 : f32 to vector<128x32xf32>
    %95 = arith.mulf %94, %93 : vector<128x32xf32>
    %cst_49 = arith.constant 0.707106769 : f32
    %96 = vector.broadcast %cst_49 : f32 to vector<128x32xf32>
    %97 = arith.mulf %93, %96 : vector<128x32xf32>
    %98 = math.erf %97 : vector<128x32xf32>
    %cst_50 = arith.constant 1.000000e+00 : f32
    %99 = vector.broadcast %cst_50 : f32 to vector<128x32xf32>
    %100 = arith.addf %99, %98 : vector<128x32xf32>
    %101 = arith.mulf %95, %100 : vector<128x32xf32>
    %102 = arith.truncf %101 : vector<128x32xf32> to vector<128x32xbf16>
    %c0_51 = arith.constant 0 : index
    %c0_52 = arith.constant 0 : index
    %103 = vector.load %arg14[%c0_51, %c0_52] : memref<32x1xbf16, #tpu.memory_space<vmem>>, vector<32x1xbf16>
    %cst_53 = arith.constant dense<0.000000e+00> : vector<128x1xf32>
    %104 = tpu.matmul %102, %103, %cst_53 {dimension_numbers = #tpu.dot_dimension_numbers<[1], [0], [0], [1], [0, 0, 1, 1], [], []>} : vector<128x32xbf16>, vector<32x1xbf16>, vector<128x1xf32> -> vector<128x1xf32>
    %c0_54 = arith.constant 0 : index
    %c0_55 = arith.constant 0 : index
    %105 = vector.load %arg15[%c0_54, %c0_55] : memref<1x1xf32, #tpu.memory_space<vmem>>, vector<1x1xf32>
    %106 = vector.broadcast %105 : vector<1x1xf32> to vector<128x1xf32>
    %107 = arith.addf %104, %106 : vector<128x1xf32>
    %108 = tpu.iota {dimensions = array<i32: 1>} : vector<1x2xi32>
    %109 = arith.sitofp %108 : vector<1x2xi32> to vector<1x2xf32>
    %cst_56 = arith.constant 2.000000e+00 : f32
    %110 = vector.broadcast %cst_56 : f32 to vector<1x2xf32>
    %111 = arith.mulf %110, %109 : vector<1x2xf32>
    %cst_57 = arith.constant 1.000000e+00 : f32
    %112 = vector.broadcast %cst_57 : f32 to vector<1x2xf32>
    %113 = arith.subf %111, %112 : vector<1x2xf32>
    %114 = vector.broadcast %107 : vector<128x1xf32> to vector<128x2xf32>
    %115 = vector.broadcast %113 : vector<1x2xf32> to vector<128x2xf32>
    %116 = arith.mulf %114, %115 : vector<128x2xf32>
    %cst_58 = arith.constant 0.000000e+00 : f32
    %117 = vector.broadcast %cst_58 : f32 to vector<128x2xf32>
    %118 = arith.maximumf %116, %117 : vector<128x2xf32>
    %119 = math.absf %116 : vector<128x2xf32>
    %cst_59 = arith.constant 0.000000e+00 : f32
    %120 = vector.broadcast %cst_59 : f32 to vector<128x2xf32>
    %121 = arith.subf %120, %119 : vector<128x2xf32>
    %122 = math.exp %121 : vector<128x2xf32>
    %cst_60 = arith.constant 1.000000e+00 : f32
    %123 = vector.broadcast %cst_60 : f32 to vector<128x2xf32>
    %124 = arith.addf %123, %122 : vector<128x2xf32>
    %125 = math.log %124 : vector<128x2xf32>
    %126 = arith.addf %118, %125 : vector<128x2xf32>
    %cst_61 = arith.constant 0.000000e+00 : f32
    %127 = vector.broadcast %cst_61 : f32 to vector<128x2xf32>
    %128 = arith.subf %127, %126 : vector<128x2xf32>
    %129 = vector.shape_cast %128 : vector<128x2xf32> to vector<8x16x2xf32>
    %c0_62 = arith.constant 0 : index
    %c0_63 = arith.constant 0 : index
    %c0_64 = arith.constant 0 : index
    %130 = vector.load %arg16[%c0_62, %c0_63, %c0_64] : memref<8x16x2xf32, #tpu.memory_space<vmem>>, vector<8x16x2xf32>
    tpu.vector_store %arg16[%c0_62, %c0_63, %c0_64], %129 {strides = array<i32>} : memref<8x16x2xf32, #tpu.memory_space<vmem>>, vector<8x16x2xf32>,
    return
  }
  func.func @transform_0(%arg0: i32) -> (i32, i32, i32) {
    %c0_i32 = arith.constant 0 : i32
    %c0_i32_0 = arith.constant 0 : i32
    %c0_i32_1 = arith.constant 0 : i32
    return %arg0, %c0_i32, %c0_i32_0 : i32, i32, i32
  }
  func.func @transform_1(%arg0: i32) -> (i32, i32, i32) {
    %c0_i32 = arith.constant 0 : i32
    %c0_i32_0 = arith.constant 0 : i32
    %c0_i32_1 = arith.constant 0 : i32
    return %arg0, %c0_i32, %c0_i32_0 : i32, i32, i32
  }
  func.func @transform_2(%arg0: i32) -> (i32, i32) {
    %c0_i32 = arith.constant 0 : i32
    %c0_i32_0 = arith.constant 0 : i32
    %c0_i32_1 = arith.constant 0 : i32
    return %c0_i32, %c0_i32_0 : i32, i32
  }
  func.func @transform_3(%arg0: i32) -> (i32, i32) {
    %c0_i32 = arith.constant 0 : i32
    %c0_i32_0 = arith.constant 0 : i32
    %c0_i32_1 = arith.constant 0 : i32
    return %c0_i32, %c0_i32_0 : i32, i32
  }
  func.func @transform_4(%arg0: i32) -> (i32, i32) {
    %c0_i32 = arith.constant 0 : i32
    %c0_i32_0 = arith.constant 0 : i32
    %c0_i32_1 = arith.constant 0 : i32
    return %c0_i32, %c0_i32_0 : i32, i32
  }
  func.func @transform_5(%arg0: i32) -> (i32, i32) {
    %c0_i32 = arith.constant 0 : i32
    %c0_i32_0 = arith.constant 0 : i32
    %c0_i32_1 = arith.constant 0 : i32
    return %c0_i32, %c0_i32_0 : i32, i32
  }
  func.func @transform_6(%arg0: i32) -> (i32, i32) {
    %c0_i32 = arith.constant 0 : i32
    %c0_i32_0 = arith.constant 0 : i32
    %c0_i32_1 = arith.constant 0 : i32
    return %c0_i32, %c0_i32_0 : i32, i32
  }
  func.func @transform_7(%arg0: i32) -> (i32, i32) {
    %c0_i32 = arith.constant 0 : i32
    %c0_i32_0 = arith.constant 0 : i32
    %c0_i32_1 = arith.constant 0 : i32
    return %c0_i32, %c0_i32_0 : i32, i32
  }
  func.func @transform_8(%arg0: i32) -> (i32, i32) {
    %c0_i32 = arith.constant 0 : i32
    %c0_i32_0 = arith.constant 0 : i32
    %c0_i32_1 = arith.constant 0 : i32
    return %c0_i32, %c0_i32_0 : i32, i32
  }
  func.func @transform_9(%arg0: i32) -> (i32, i32) {
    %c0_i32 = arith.constant 0 : i32
    %c0_i32_0 = arith.constant 0 : i32
    %c0_i32_1 = arith.constant 0 : i32
    return %c0_i32, %c0_i32_0 : i32, i32
  }
  func.func @transform_10(%arg0: i32) -> (i32, i32) {
    %c0_i32 = arith.constant 0 : i32
    %c0_i32_0 = arith.constant 0 : i32
    %c0_i32_1 = arith.constant 0 : i32
    return %c0_i32, %c0_i32_0 : i32, i32
  }
  func.func @transform_11(%arg0: i32) -> (i32, i32) {
    %c0_i32 = arith.constant 0 : i32
    %c0_i32_0 = arith.constant 0 : i32
    %c0_i32_1 = arith.constant 0 : i32
    return %c0_i32, %c0_i32_0 : i32, i32
  }
  func.func @transform_12(%arg0: i32) -> (i32, i32) {
    %c0_i32 = arith.constant 0 : i32
    %c0_i32_0 = arith.constant 0 : i32
    %c0_i32_1 = arith.constant 0 : i32
    return %c0_i32, %c0_i32_0 : i32, i32
  }
  func.func @transform_13(%arg0: i32) -> (i32, i32) {
    %c0_i32 = arith.constant 0 : i32
    %c0_i32_0 = arith.constant 0 : i32
    %c0_i32_1 = arith.constant 0 : i32
    return %c0_i32, %c0_i32_0 : i32, i32
  }
  func.func @transform_14(%arg0: i32) -> (i32, i32) {
    %c0_i32 = arith.constant 0 : i32
    %c0_i32_0 = arith.constant 0 : i32
    %c0_i32_1 = arith.constant 0 : i32
    return %c0_i32, %c0_i32_0 : i32, i32
  }
  func.func @transform_15(%arg0: i32) -> (i32, i32, i32) {
    %c0_i32 = arith.constant 0 : i32
    %c0_i32_0 = arith.constant 0 : i32
    %c0_i32_1 = arith.constant 0 : i32
    return %arg0, %c0_i32, %c0_i32_0 : i32, i32, i32
  }
}

</mosaic_0001>

<bundles_post_ra>
// kernel: tpu_custom_call.1
= control target key start
LH: loop header
LB: loop body
LE: loop exit
PB: predicated region body
PF: predicated region fallthrough
CT: control target
= control target key end

     0   :  { %vm997_vm0 = vcmask 7168   ;;  %vm2900_vm1 = vmmov 0   ;;  %vm924_vm2 = vcmask 523264   ;;  %vm1327_vm3 = vcmask 1041409   ;;  %s3855_s0 = inlined_call_operand.vmem [shape: bf16[8,16,128], index: 0, kind: input, shape index: {}]   ;;  %s3856_s4 = inlined_call_operand.vmem [shape: bf16[128,64], index: 4, kind: input, shape index: {}]   ;;  %s3857_s5 = inlined_call_operand.vmem [shape: bf16[128,64], index: 5, kind: input, shape index: {}]   ;;  %s3858_s1 = inlined_call_operand.vmem [shape: f32[8,16,1], index: 1, kind: input, shape index: {}]   ;;  %s3859_s2 = inlined_call_operand.vmem [shape: f32[1,128], index: 2, kind: input, shape index: {}]   ;;  %s3860_s3 = inlined_call_operand.vmem [shape: f32[1,128], index: 3, kind: input, shape index: {}]   ;;  %s3861_s8 = inlined_call_operand.vmem [shape: bf16[64,64], index: 8, kind: input, shape index: {}]   ;;  %s3862_s9 = inlined_call_operand.vmem [shape: bf16[64,64], index: 9, kind: input, shape index: {}]   ;;  %s3863_s6 = inlined_call_operand.vmem [shape: f32[1,64], index: 6, kind: input, shape index: {}]   ;;  %s3864_s7 = inlined_call_operand.vmem [shape: f32[1,64], index: 7, kind: input, shape index: {}]   ;;  %s3865_s11 = inlined_call_operand.vmem [shape: bf16[64,32], index: 11, kind: input, shape index: {}]   ;;  %s3866_s10 = inlined_call_operand.vmem [shape: f32[1,64], index: 10, kind: input, shape index: {}]   ;;  %s3867_s13 = inlined_call_operand.vmem [shape: bf16[32,1], index: 13, kind: input, shape index: {}]   ;;  %s3868_s14 = inlined_call_operand.<no memory space> [shape: f32[1,1], index: 14, kind: input, shape index: {}]   ;;  %s3869_s12 = inlined_call_operand.vmem [shape: f32[1,32], index: 12, kind: input, shape index: {}]   ;;  %s3870_s15 = inlined_call_operand.vmem [shape: f32[8,16,2], index: 15, kind: output, shape index: {}]  }
   0x1   :  { %v2365_v0 = vld [vmem:[%s3855_s0] sm:$0xff]   ;;  %v2396_v1 = vld [vmem:[%s3855_s0 + $0x8] sm:$0xff]   ;;  %v2397_v6 = vld [vmem:[%s3855_s0 + $0x10] sm:$0xff]   ;;  %vm1329_vm4 = vcmask 1042434   ;;  %vm1331_vm5 = vcmask 1043459   ;;  %vm1333_vm6 = vcmask 1044484  }
   0x2   :  { %v2366_v2 = vunpack.c.l.bf16 %v2365_v0  ;;  %v2370_v3 = vunpack.c.l.bf16 %v2396_v1  ;;  %v2367_v4 = vunpack.c.h.bf16 %v2365_v0  ;;  %v2371_v5 = vunpack.c.h.bf16 %v2396_v1  ;;  %v2398_v9 = vld [vmem:[%s3855_s0 + $0x18] sm:$0xff]   ;;  %v2997_v12 = vld [vmem:[%s3855_s0 + $0x20] sm:$0xff]   ;;  %v3004_v15 = vld [vmem:[%s3855_s0 + $0x28] sm:$0xff]  }
   0x3   :  { %v2374_v7 = vunpack.c.l.bf16 %v2397_v6  ;;  %v2375_v8 = vunpack.c.h.bf16 %v2397_v6  ;;  %v2378_v10 = vunpack.c.l.bf16 %v2398_v9  ;;  %v2379_v11 = vunpack.c.h.bf16 %v2398_v9  ;;  %v3013_v18 = vld [vmem:[%s3855_s0 + $0x30] sm:$0xff]   ;;  %v3024_v21 = vld [vmem:[%s3855_s0 + $0x38] sm:$0xff]  }
   0x4   :  { %85 = vadd.xlane.f32.xlu0 %v2366_v2  ;;  %89 = vadd.xlane.f32.xlu1 %v2370_v3  ;;  %v2382_v13 = vunpack.c.l.bf16 %v2997_v12  ;;  %v2383_v14 = vunpack.c.h.bf16 %v2997_v12  ;;  %v2386_v16 = vunpack.c.l.bf16 %v3004_v15  ;;  %v2387_v17 = vunpack.c.h.bf16 %v3004_v15  ;;  %v2628_v59 = vld [vmem:[%s3856_s4 + $0x38] sm:$0xff]   ;;  %v2631_v6 = vld [vmem:[%s3857_s5 + $0x30] sm:$0xff]   ;;  %v2632_v15 = vld [vmem:[%s3856_s4 + $0x28] sm:$0xff]  }
   0x5   :  { %v2390_v19 = vunpack.c.l.bf16 %v3013_v18  ;;  %v2391_v20 = vunpack.c.h.bf16 %v3013_v18  ;;  %v2394_v22 = vunpack.c.l.bf16 %v3024_v21  ;;  %v2395_v23 = vunpack.c.h.bf16 %v3024_v21  ;;  %v2629_v63 = vld [vmem:[%s3857_s5 + $0x38] sm:$0xff]   ;;  %2474 = vmatprep.subr.bf16.mxu0 %v2628_v59  ;;  %v2634_v18 = vld [vmem:[%s3856_s4 + $0x20] sm:$0xff]  }
   0x6   :  { %2506 = vmatprep.subr.bf16.mxu1 %v2629_v63  ;;  %2475 = vmatpush3.bf16.msra.mxu0 %v2628_v59  ;;  %v2637_v21 = vld [vmem:[%s3857_s5 + $0x18] sm:$0xff]   ;;  %vm1335_vm7 = vcmask 1045509   ;;  %vm1337_vm8 = vcmask 1046534   ;;  %vm1339_vm9 = vcmask 1047559   ;;  %vm1897_vm10 = vcmask 261120  }
   0x7   :  { %2507 = vmatpush3.bf16.msra.mxu1 %v2629_v63  ;;  %vm2280_vm11 = vcmask 15360  }
   0x8   :  { %87 = vadd.xlane.f32.xlu0 %v2367_v4  ;;  %91 = vadd.xlane.f32.xlu1 %v2371_v5 }
   0x9   :  { %2508 = vmatprep.subr.bf16.mxu1 %v2631_v6 }
   0xb   :  { %2509 = vmatpush3.bf16.msra.mxu1 %v2631_v6  ;;  %v821_v6 = vld [vmem:[%s3858_s1 + $0x48] sm:$0xff] }
   0xc   :  { %93 = vadd.xlane.f32.xlu0 %v2374_v7  ;;  %95 = vadd.xlane.f32.xlu1 %v2375_v8 }
  0x10   :  { %97 = vadd.xlane.f32.xlu0 %v2378_v10  ;;  %99 = vadd.xlane.f32.xlu1 %v2379_v11 }
  0x14   :  { %101 = vadd.xlane.f32.xlu0 %v2382_v13  ;;  %103 = vadd.xlane.f32.xlu1 %v2383_v14 }
  0x18   :  { %105 = vadd.xlane.f32.xlu0 %v2386_v16  ;;  %107 = vadd.xlane.f32.xlu1 %v2387_v17 }
  0x1c   :  { %109 = vadd.xlane.f32.xlu0 %v2390_v19  ;;  %111 = vadd.xlane.f32.xlu1 %v2391_v20 }
  0x20   :  { %113 = vadd.xlane.f32.xlu0 %v2394_v22  ;;  %115 = vadd.xlane.f32.xlu1 %v2395_v23 }
  0x8d   :  { %v86_v24 = vpop.xlane.xlu0 %85  ;;  %v90_v25 = vpop.xlane.xlu1 %89 }
  0x8e   :  { %v118_v26 = vmul.f32 0.0078125, %v86_v24  ;;  %v120_v27 = vmul.f32 0.0078125, %v90_v25 }
  0x90   :  { %v3036_v28 = vsub.f32 %v2366_v2, %v118_v26  ;;  %v3038_v29 = vsub.f32 %v2370_v3, %v120_v27 }
  0x91   :  { %v88_v30 = vpop.xlane.xlu0 %87  ;;  %v92_v31 = vpop.xlane.xlu1 %91 }
  0x92   :  { %v119_v32 = vmul.f32 0.0078125, %v88_v30  ;;  %v150_v33 = vmul.f32 %v3036_v28, %v3036_v28  ;;  %v121_v34 = vmul.f32 0.0078125, %v92_v31  ;;  %v152_v37 = vmul.f32 %v3038_v29, %v3038_v29 }
  0x94   :  { %v3042_v35 = vsub.f32 %v2367_v4, %v119_v32  ;;  %166 = vadd.xlane.f32.xlu0 %v150_v33  ;;  %v3044_v36 = vsub.f32 %v2371_v5, %v121_v34  ;;  %v2630_v5 = vld [vmem:[%s3856_s4 + $0x30] sm:$0xff]  }
  0x95   :  { %v94_v38 = vpop.xlane.xlu0 %93  ;;  %v96_v39 = vpop.xlane.xlu1 %95  ;;  %2476 = vmatprep.subr.bf16.mxu0 %v2630_v5 }
  0x96   :  { %v122_v40 = vmul.f32 0.0078125, %v94_v38  ;;  %v151_v41 = vmul.f32 %v3042_v35, %v3042_v35  ;;  %v123_v42 = vmul.f32 0.0078125, %v96_v39  ;;  %v153_v45 = vmul.f32 %v3044_v36, %v3044_v36  ;;  %2477 = vmatpush3.bf16.msra.mxu0 %v2630_v5  ;;  %v2638_v38 = vld [vmem:[%s3856_s4 + $0x10] sm:$0xff]  }
  0x97   :  { %2478 = vmatprep.subr.bf16.mxu0 %v2632_v15  ;;  %v2639_v39 = vld [vmem:[%s3857_s5 + $0x10] sm:$0xff]  }
  0x98   :  { %v3050_v43 = vsub.f32 %v2374_v7, %v122_v40  ;;  %170 = vadd.xlane.f32.xlu0 %v152_v37  ;;  %168 = vadd.xlane.f32.xlu1 %v151_v41  ;;  %v3052_v44 = vsub.f32 %v2375_v8, %v123_v42  ;;  %v2640_v40 = vld [vmem:[%s3856_s4 + $0x8] sm:$0xff]   ;;  %v2642_v42 = vld [vmem:[%s3856_s4] sm:$0xff]  }
  0x99   :  { %v98_v46 = vpop.xlane.xlu0 %97  ;;  %v100_v47 = vpop.xlane.xlu1 %99  ;;  %v2641_v41 = vld [vmem:[%s3857_s5 + $0x8] sm:$0xff]  }
  0x9a   :  { %v124_v48 = vmul.f32 0.0078125, %v98_v46  ;;  %v154_v49 = vmul.f32 %v3050_v43, %v3050_v43  ;;  %v125_v50 = vmul.f32 0.0078125, %v100_v47  ;;  %v155_v53 = vmul.f32 %v3052_v44, %v3052_v44  ;;  %2479 = vmatpush3.bf16.msra.mxu0 %v2632_v15  ;;  %v812_v47 = vld [vmem:[%s3858_s1] sm:$0xff]  ;;  %v823_v15 = vld [vmem:[%s3858_s1 + $0x58] sm:$0xff] }
  0x9b   :  { %2480 = vmatprep.subr.bf16.mxu0 %v2634_v18  ;;  %v2898_v46 = vmov 0  }
  0x9c   :  { %v3058_v51 = vsub.f32 %v2378_v10, %v124_v48  ;;  %172 = vadd.xlane.f32.xlu1 %v153_v45  ;;  %174 = vadd.xlane.f32.xlu0 %v154_v49  ;;  %v3060_v52 = vsub.f32 %v2379_v11, %v125_v50  ;;  %v2643_v45 = vld [vmem:[%s3857_s5] sm:$0xff]   ;;  %v813_v48 = vld [vmem:[%s3858_s1 + $0x8] sm:$0xff]  ;;  %v814_v49 = vld [vmem:[%s3858_s1 + $0x10] sm:$0xff]  ;;  %v998_v50 = vsel %vm997_vm0, %v812_v47, 0.0 }
  0x9d   :  { %v102_v54 = vpop.xlane.xlu0 %101  ;;  %v104_v55 = vpop.xlane.xlu1 %103  ;;  %2627 = vset.pattern.permute.xlu1 %v2898_v46  ;;  %2626 = vset.pattern.permute.xlu0 %v2898_v46 }
  0x9e   :  { %v126_v56 = vmul.f32 0.0078125, %v102_v54  ;;  %v156_v57 = vmul.f32 %v3058_v51, %v3058_v51  ;;  %v127_v58 = vmul.f32 0.0078125, %v104_v55  ;;  %v157_v62 = vmul.f32 %v3060_v52, %v3060_v52  ;;  %2481 = vmatpush3.bf16.msra.mxu0 %v2634_v18  ;;  %v815_v55 = vld [vmem:[%s3858_s1 + $0x18] sm:$0xff] }
  0x9f   :  { %v1007_v54 = vsel %vm997_vm0, %v814_v49, 0.0  ;;  %v1008_v59 = vsel %vm997_vm0, %v815_v55, 0.0 }
  0xa0   :  { %v3069_v60 = vsub.f32 %v2382_v13, %v126_v56  ;;  %176 = vadd.xlane.f32.xlu1 %v155_v53  ;;  %178 = vadd.xlane.f32.xlu0 %v156_v57  ;;  %v3073_v61 = vsub.f32 %v2383_v14, %v127_v58  ;;  %v999_v53 = vsel %vm997_vm0, %v813_v48, 0.0  ;;  %v816_v56 = vld [vmem:[%s3858_s1 + $0x20] sm:$0xff]  ;;  %v3183_v57 = vld [vmem:[%s3858_s1 + $0x28] sm:$0xff] }
  0xa1   :  { %v106_v0 = vpop.xlane.xlu0 %105  ;;  %v108_v1 = vpop.xlane.xlu1 %107  ;;  %v1000_v58 = vadd.f32 %v999_v53, %v998_v50  ;;  %v1017_v63 = vsel %vm997_vm0, %v3183_v57, 0.0 }
  0xa2   :  { %v128_v2 = vmul.f32 0.0078125, %v106_v0  ;;  %v158_v3 = vmul.f32 %v3069_v60, %v3069_v60  ;;  %v129_v4 = vmul.f32 0.0078125, %v108_v1  ;;  %v159_v9 = vmul.f32 %v3073_v61, %v3073_v61  ;;  %v3192_v0 = vld [vmem:[%s3858_s1 + $0x30] sm:$0xff]  ;;  %v3197_v1 = vld [vmem:[%s3858_s1 + $0x38] sm:$0xff] }
  0xa3   :  { %v1026_v5 = vsel %vm997_vm0, %v3197_v1, 0.0 }
  0xa4   :  { %v3090_v7 = vsub.f32 %v2386_v16, %v128_v2  ;;  %180 = vadd.xlane.f32.xlu1 %v157_v62  ;;  %182 = vadd.xlane.f32.xlu0 %v158_v3  ;;  %v3094_v8 = vsub.f32 %v2387_v17, %v129_v4  ;;  %v2633_v16 = vld [vmem:[%s3857_s5 + $0x28] sm:$0xff]   ;;  %v1016_v62 = vsel %vm997_vm0, %v816_v56, 0.0  ;;  %v3202_v2 = vld [vmem:[%s3858_s1 + $0x40] sm:$0xff]  ;;  %v1009_v3 = vadd.f32 %v1008_v59, %v1007_v54 }
  0xa5   :  { %v110_v10 = vpop.xlane.xlu0 %109  ;;  %v112_v11 = vpop.xlane.xlu1 %111  ;;  %2510 = vmatprep.subr.bf16.mxu1 %v2633_v16  ;;  %v1025_v4 = vsel %vm997_vm0, %v3192_v0, 0.0 }
  0xa6   :  { %v130_v12 = vmul.f32 0.0078125, %v110_v10  ;;  %v160_v13 = vmul.f32 %v3090_v7, %v3090_v7  ;;  %v131_v14 = vmul.f32 0.0078125, %v112_v11  ;;  %v161_v25 = vmul.f32 %v3094_v8, %v3094_v8  ;;  %2511 = vmatpush3.bf16.msra.mxu1 %v2633_v16 }
  0xa7   :  { %v1027_v10 = vadd.f32 %v1026_v5, %v1025_v4  ;;  %v1001_v11 = vrot.slane %v1000_v58, 4 }
  0xa8   :  { %v3108_v17 = vsub.f32 %v2390_v19, %v130_v12  ;;  %184 = vadd.xlane.f32.xlu1 %v159_v9  ;;  %186 = vadd.xlane.f32.xlu0 %v160_v13  ;;  %v3112_v24 = vsub.f32 %v2391_v20, %v131_v14  ;;  %v2635_v19 = vld [vmem:[%s3857_s5 + $0x20] sm:$0xff]   ;;  %v1018_v9 = vadd.f32 %v1017_v63, %v1016_v62  ;;  %v1010_v12 = vrot.slane %v1009_v3, 4 }
  0xa9   :  { %v114_v26 = vpop.xlane.xlu0 %113  ;;  %v116_v27 = vpop.xlane.xlu1 %115  ;;  %2512 = vmatprep.subr.bf16.mxu1 %v2635_v19  ;;  %v1034_v13 = vsel %vm997_vm0, %v3202_v2, 0.0  ;;  %v1035_v14 = vsel %vm997_vm0, %v821_v6, 0.0  ;;  %v1028_v16 = vrot.slane %v1027_v10, 4 }
  0xaa   :  { %v132_v30 = vmul.f32 0.0078125, %v114_v26  ;;  %v162_v31 = vmul.f32 %v3108_v17, %v3108_v17  ;;  %v133_v32 = vmul.f32 0.0078125, %v116_v27  ;;  %v163_v34 = vmul.f32 %v3112_v24, %v3112_v24  ;;  %2513 = vmatpush3.bf16.msra.mxu1 %v2635_v19  ;;  %v3225_v26 = vld [vmem:[%s3858_s1 + $0x60] sm:$0xff] }
  0xab   :  { %2514 = vmatprep.subr.bf16.mxu1 %v2637_v21  ;;  %v1011_v27 = vadd.f32 %v1010_v12, %v1009_v3  ;;  %v1019_v18 = vrot.slane %v1018_v9, 4  ;;  %v1029_v19 = vadd.f32 %v1028_v16, %v1027_v10 }
  0xac   :  { %v3126_v20 = vsub.f32 %v2394_v22, %v132_v30  ;;  %188 = vadd.xlane.f32.xlu1 %v161_v25  ;;  %190 = vadd.xlane.f32.xlu0 %v162_v31  ;;  %v3130_v33 = vsub.f32 %v2395_v23, %v133_v32  ;;  %v2636_v22 = vld [vmem:[%s3856_s4 + $0x18] sm:$0xff]   ;;  %v3220_v25 = vld [vmem:[%s3858_s1 + $0x50] sm:$0xff]  ;;  %v825_v31 = vld [vmem:[%s3858_s1 + $0x68] sm:$0xff] }
  0xad   :  { %2482 = vmatprep.subr.bf16.mxu0 %v2636_v22  ;;  %v1043_v30 = vsel %vm997_vm0, %v3220_v25, 0.0  ;;  %v827_v32 = vld [vmem:[%s3858_s1 + $0x78] sm:$0xff] }
  0xae   :  { %v164_v37 = vmul.f32 %v3126_v20, %v3126_v20  ;;  %v165_v23 = vmul.f32 %v3130_v33, %v3130_v33  ;;  %2483 = vmatpush3.bf16.msra.mxu0 %v2636_v22  ;;  %2515 = vmatpush3.bf16.msra.mxu1 %v2637_v21  ;;  %v1044_v22 = vsel %vm997_vm0, %v823_v15, 0.0  ;;  %v1002_v21 = vadd.f32 %v1001_v11, %v1000_v58 }
  0xaf   :  { %2484 = vmatprep.subr.bf16.mxu0 %v2638_v38  ;;  %2516 = vmatprep.subr.bf16.mxu1 %v2639_v39 }
  0xb0   :  { %192 = vadd.xlane.f32.xlu1 %v163_v34  ;;  %194 = vadd.xlane.f32.xlu0 %v164_v37  ;;  %v1036_v34 = vadd.f32 %v1035_v14, %v1034_v13  ;;  %v3238_v37 = vld [vmem:[%s3858_s1 + $0x70] sm:$0xff]  ;;  %v1003_v53 = vrot.slane %v1002_v21, 2 }
  0xb2   :  { %2485 = vmatpush3.bf16.msra.mxu0 %v2638_v38  ;;  %2517 = vmatpush3.bf16.msra.mxu1 %v2639_v39  ;;  %v1052_v38 = vsel %vm997_vm0, %v3225_v26, 0.0  ;;  %v1061_v39 = vsel %vm997_vm0, %v3238_v37, 0.0  ;;  %v1004_v11 = vadd.f32 %v1003_v53, %v1002_v21 }
  0xb3   :  { %2486 = vmatprep.subr.bf16.mxu0 %v2640_v40  ;;  %2518 = vmatprep.subr.bf16.mxu1 %v2641_v41 }
  0xb4   :  { %196 = vadd.xlane.f32.xlu1 %v165_v23  ;;  %v1012_v23 = vrot.slane %v1011_v27, 2  ;;  %v1005_v16 = vrot.slane %v1004_v11, 1 }
  0xb6   :  { %2487 = vmatpush3.bf16.msra.mxu0 %v2640_v40  ;;  %2519 = vmatpush3.bf16.msra.mxu1 %v2641_v41  ;;  %v1030_v40 = vrot.slane %v1029_v19, 2  ;;  %v1053_v41 = vsel %vm997_vm0, %v825_v31, 0.0  ;;  %v1013_v46 = vadd.f32 %v1012_v23, %v1011_v27  ;;  %v1006_v21 = vadd.f32 %v1005_v16, %v1004_v11 }
  0xb7   :  { %2488 = vmatprep.subr.bf16.mxu0 %v2642_v42  ;;  %2520 = vmatprep.subr.bf16.mxu1 %v2643_v45  ;;  %v1054_v58 = vadd.f32 %v1053_v41, %v1052_v38 }
  0xb8   :  { %v1014_v54 = vrot.slane %v1013_v46, 1 }
  0xb9   :  { %v1055_v12 = vrot.slane %v1054_v58, 4 }
  0xba   :  { %2489 = vmatpush3.bf16.msra.mxu0 %v2642_v42  ;;  %2521 = vmatpush3.bf16.msra.mxu1 %v2643_v45  ;;  %v1045_v42 = vadd.f32 %v1044_v22, %v1043_v30  ;;  %v1062_v45 = vsel %vm997_vm0, %v827_v32, 0.0  ;;  %v1015_v3 = vadd.f32 %v1014_v54, %v1013_v46 }
  0xbb   :  { %v1063_v50 = vadd.f32 %v1062_v45, %v1061_v39 }
  0xbc   :  { %2658 = vrcp.f32 %v1015_v3 }
  0xbd   :  { %v1064_v63 = vrot.slane %v1063_v50, 4 }
  0xbf   :  { %v1065_v10 = vadd.f32 %v1064_v63, %v1063_v50 }
  0xc5   :  { %835 = vperm.xlu1 %2627, %v813_v48   ;;  %v1031_v48 = vadd.f32 %v1030_v40, %v1029_v19 }
  0xc6   :  { %830 = vperm.xlu0 %2626, %v812_v47   ;;  %v1020_v47 = vadd.f32 %v1019_v18, %v1018_v9 }
  0xc7   :  { %v1032_v59 = vrot.slane %v1031_v48, 1 }
  0xc8   :  { %v1021_v4 = vrot.slane %v1020_v47, 2 }
  0xc9   :  { %840 = vperm.xlu1 %2627, %v814_v49   ;;  %v1046_v49 = vrot.slane %v1045_v42, 4  ;;  %v1033_v5 = vadd.f32 %v1032_v59, %v1031_v48 }
  0xca   :  { %875 = vperm.xlu0 %2626, %v821_v6   ;;  %v1022_v27 = vadd.f32 %v1021_v4, %v1020_v47 }
  0xcb   :  { %v1047_v62 = vadd.f32 %v1046_v49, %v1045_v42  ;;  %2660 = vrcp.f32 %v1033_v5 }
  0xcd   :  { %845 = vperm.xlu1 %2627, %v815_v55   ;;  %v1037_v55 = vrot.slane %v1036_v34, 4  ;;  %v1048_v6 = vrot.slane %v1047_v62, 2 }
  0xce   :  { %885 = vperm.xlu0 %2626, %v823_v15  }
  0xcf   :  { %v1038_v9 = vadd.f32 %v1037_v55, %v1036_v34  ;;  %v1049_v13 = vadd.f32 %v1048_v6, %v1047_v62 }
  0xd1   :  { %850 = vperm.xlu1 %2627, %v816_v56   ;;  %v1066_v56 = vrot.slane %v1065_v10, 2  ;;  %v1050_v14 = vrot.slane %v1049_v13, 1  ;;  %v1039_v30 = vrot.slane %v1038_v9, 2 }
  0xd2   :  { %895 = vperm.xlu0 %2626, %v825_v31   ;;  %v1056_v31 = vadd.f32 %v1055_v12, %v1054_v58 }
  0xd3   :  { %v1067_v15 = vadd.f32 %v1066_v56, %v1065_v10  ;;  %v1051_v18 = vadd.f32 %v1050_v14, %v1049_v13 }
  0xd4   :  { %v1057_v34 = vrot.slane %v1056_v31, 2 }
  0xd5   :  { %855 = vperm.xlu1 %2627, %v3183_v57   ;;  %v1068_v19 = vrot.slane %v1067_v15, 1  ;;  %2662 = vrcp.f32 %v1051_v18  ;;  %v1023_v57 = vrot.slane %v1022_v27, 1 }
  0xd6   :  { %905 = vperm.xlu0 %2626, %v827_v32   ;;  %v1040_v32 = vadd.f32 %v1039_v30, %v1038_v9  ;;  %v1058_v39 = vadd.f32 %v1057_v34, %v1056_v31 }
  0xd7   :  { %v1069_v22 = vadd.f32 %v1068_v19, %v1067_v15  ;;  %v1024_v23 = vadd.f32 %v1023_v57, %v1022_v27 }
  0xd8   :  { %v1041_v38 = vrot.slane %v1040_v32, 1  ;;  %v1059_v42 = vrot.slane %v1058_v39, 1 }
  0xd9   :  { %860 = vperm.xlu1 %2627, %v3192_v0   ;;  %2664 = vrcp.f32 %v1069_v22  ;;  %v2659_v0 = vpop.eup %2658  ;;  %v3258_v22 = vld [vmem:[%s3859_s2] ss:$0 sm:$0xff] }
  0xda   :  { %2666 = vrcp.f32 %v1006_v21  ;;  %1085 = vperm.xlu0 %2626, %v2659_v0   ;;  %v2661_v40 = vpop.eup %2660  ;;  %v1042_v41 = vadd.f32 %v1041_v38, %v1040_v32 }
  0xdb   :  { %2668 = vrcp.f32 %v1024_v23 }
  0xdc   :  { %2670 = vrcp.f32 %v1042_v41 }
  0xdd   :  { %865 = vperm.xlu1 %2627, %v3197_v1   ;;  %v1060_v1 = vadd.f32 %v1059_v42, %v1058_v39 }
  0xde   :  { %1095 = vperm.xlu0 %2626, %v2661_v40  }
  0xdf   :  { %2672 = vrcp.f32 %v1060_v1 }
  0xe1   :  { %870 = vperm.xlu1 %2627, %v3202_v2  }
  0xe2   :  { %v2663_v45 = vpop.eup %2662 }
  0xe3   :  { %1105 = vperm.xlu0 %2626, %v2663_v45  }
  0xe5   :  { %880 = vperm.xlu1 %2627, %v3220_v25  }
  0xe6   :  { %v2665_v46 = vpop.eup %2664 }
  0xe7   :  { %v2667_v2 = vpop.eup %2666  ;;  %1115 = vperm.xlu0 %2626, %v2665_v46  }
  0xe8   :  { %v2669_v47 = vpop.eup %2668 }
  0xe9   :  { %890 = vperm.xlu1 %2627, %v3225_v26   ;;  %v2671_v48 = vpop.eup %2670 }
  0xec   :  { %v2673_v25 = vpop.eup %2672 }
  0xed   :  { %900 = vperm.xlu1 %2627, %v3238_v37  }
  0xf1   :  { %1080 = vperm.xlu1 %2627, %v2667_v2  }
  0xf5   :  { %1090 = vperm.xlu1 %2627, %v2669_v47  }
  0xf9   :  { %1100 = vperm.xlu1 %2627, %v2671_v48  }
  0xfd   :  { %1110 = vperm.xlu1 %2627, %v2673_v25  }
 0x11d   :  { %v167_v49 = vpop.xlane.xlu0 %166 }
 0x11e   :  { %v198_v50 = vmul.f32 0.0078125, %v167_v49 }
 0x120   :  { %v214_v53 = vadd.f32 1e-05, %v198_v50 }
 0x121   :  { %v169_v54 = vpop.xlane.xlu1 %168  ;;  %v171_v55 = vpop.xlane.xlu0 %170 }
 0x122   :  { %2674 = vrsqrt.f32 %v214_v53  ;;  %v199_v26 = vmul.f32 0.0078125, %v169_v54  ;;  %v200_v58 = vmul.f32 0.0078125, %v171_v55 }
 0x124   :  { %v215_v59 = vadd.f32 1e-05, %v199_v26  ;;  %v216_v62 = vadd.f32 1e-05, %v200_v58 }
 0x125   :  { %v173_v37 = vpop.xlane.xlu1 %172  ;;  %v175_v63 = vpop.xlane.xlu0 %174 }
 0x126   :  { %2676 = vrsqrt.f32 %v215_v59  ;;  %v201_v3 = vmul.f32 0.0078125, %v173_v37  ;;  %v202_v4 = vmul.f32 0.0078125, %v175_v63 }
 0x127   :  { %2678 = vrsqrt.f32 %v216_v62 }
 0x128   :  { %v217_v5 = vadd.f32 1e-05, %v201_v3  ;;  %v218_v6 = vadd.f32 1e-05, %v202_v4 }
 0x129   :  { %v177_v10 = vpop.xlane.xlu1 %176  ;;  %v179_v11 = vpop.xlane.xlu0 %178 }
 0x12a   :  { %2680 = vrsqrt.f32 %v217_v5  ;;  %v203_v9 = vmul.f32 0.0078125, %v177_v10  ;;  %v204_v12 = vmul.f32 0.0078125, %v179_v11 }
 0x12b   :  { %2682 = vrsqrt.f32 %v218_v6 }
 0x12c   :  { %v219_v13 = vadd.f32 1e-05, %v203_v9  ;;  %v220_v56 = vadd.f32 1e-05, %v204_v12 }
 0x12d   :  { %v181_v14 = vpop.xlane.xlu1 %180  ;;  %v183_v15 = vpop.xlane.xlu0 %182 }
 0x12e   :  { %2684 = vrsqrt.f32 %v219_v13  ;;  %v205_v16 = vmul.f32 0.0078125, %v181_v14  ;;  %v206_v27 = vmul.f32 0.0078125, %v183_v15 }
 0x12f   :  { %v2675_v30 = vpop.eup %2674  ;;  %2686 = vrsqrt.f32 %v220_v56 }
 0x130   :  { %v221_v31 = vadd.f32 1e-05, %v205_v16  ;;  %v222_v18 = vadd.f32 1e-05, %v206_v27  ;;  %v246_v19 = vmul.f32 %v2675_v30, %v3036_v28  ;;  %v3265_v28 = vld [vmem:[%s3860_s3] ss:$0 sm:$0xff] }
 0x131   :  { %v185_v21 = vpop.xlane.xlu1 %184  ;;  %v187_v57 = vpop.xlane.xlu0 %186 }
 0x132   :  { %2688 = vrsqrt.f32 %v221_v31  ;;  %v207_v32 = vmul.f32 0.0078125, %v185_v21  ;;  %v208_v34 = vmul.f32 0.0078125, %v187_v57  ;;  %v269_v38 = vmul.f32 %v3258_v22, %v246_v19 }
 0x133   :  { %v2677_v23 = vpop.eup %2676  ;;  %2690 = vrsqrt.f32 %v222_v18 }
 0x134   :  { %v2679_v39 = vpop.eup %2678  ;;  %v223_v0 = vadd.f32 1e-05, %v207_v32  ;;  %v224_v40 = vadd.f32 1e-05, %v208_v34  ;;  %v247_v41 = vmul.f32 %v2677_v23, %v3042_v35  ;;  %v292_v25 = vadd.f32 %v3265_v28, %v269_v38 }
 0x135   :  { %v189_v42 = vpop.xlane.xlu1 %188  ;;  %v191_v45 = vpop.xlane.xlu0 %190  ;;  %v248_v1 = vmul.f32 %v2679_v39, %v3038_v29 }
 0x136   :  { %2692 = vrsqrt.f32 %v223_v0  ;;  %v209_v46 = vmul.f32 0.0078125, %v189_v42  ;;  %v210_v2 = vmul.f32 0.0078125, %v191_v45  ;;  %v270_v47 = vmul.f32 %v3258_v22, %v247_v41 }
 0x137   :  { %v2681_v48 = vpop.eup %2680  ;;  %2694 = vrsqrt.f32 %v224_v40  ;;  %v271_v29 = vmul.f32 %v3258_v22, %v248_v1 }
 0x138   :  { %v2683_v49 = vpop.eup %2682  ;;  %v225_v35 = vadd.f32 1e-05, %v209_v46  ;;  %v226_v50 = vadd.f32 1e-05, %v210_v2  ;;  %v293_v53 = vadd.f32 %v3265_v28, %v270_v47  ;;  %v249_v54 = vmul.f32 %v2681_v48, %v3044_v36 }
 0x139   :  { %v193_v55 = vpop.xlane.xlu1 %192  ;;  %v195_v26 = vpop.xlane.xlu0 %194  ;;  %v250_v58 = vmul.f32 %v2683_v49, %v3050_v43  ;;  %v294_v43 = vadd.f32 %v3265_v28, %v271_v29 }
 0x13a   :  { %2696 = vrsqrt.f32 %v225_v35  ;;  %v211_v59 = vmul.f32 0.0078125, %v193_v55  ;;  %v212_v62 = vmul.f32 0.0078125, %v195_v26  ;;  %v308_v37 = vpack.c.bf16 %v293_v53, %v292_v25 }
 0x13b   :  { %v2685_v63 = vpop.eup %2684  ;;  %2698 = vrsqrt.f32 %v226_v50  ;;  %v272_v3 = vmul.f32 %v3258_v22, %v249_v54  ;;  %v273_v10 = vmul.f32 %v3258_v22, %v250_v58 }
 0x13c   :  { %v2687_v4 = vpop.eup %2686  ;;  %v227_v5 = vadd.f32 1e-05, %v211_v59  ;;  %v228_v6 = vadd.f32 1e-05, %v212_v62  ;;  %2490 = vmatprep.mubr.bf16.mxu0 %v308_v37  ;;  %2522 = vmatprep.mubr.bf16.mxu1 %v308_v37  ;;  %v251_v36 = vmul.f32 %v2685_v63, %v3052_v44  ;;  %v2645_v63 = vld [vmem:[%s3861_s8 + $0x10] sm:$0xff]  }
 0x13d   :  { %v197_v11 = vpop.xlane.xlu1 %196  ;;  %v295_v9 = vadd.f32 %v3265_v28, %v272_v3  ;;  %v252_v12 = vmul.f32 %v2687_v4, %v3058_v51  ;;  %v296_v30 = vadd.f32 %v3265_v28, %v273_v10  ;;  %v2648_v3 = vld [vmem:[%s3862_s9 + $0x18] sm:$0xff]   ;;  %v2899_v4 = vmov 0.0   ;;  %v3339_v10 = vld [vmem:[%s3863_s6] ss:$0 sm:$0xff] }
 0x13e   :  { %2700 = vrsqrt.f32 %v227_v5  ;;  %v213_v13 = vmul.f32 0.0078125, %v197_v11  ;;  %v274_v56 = vmul.f32 %v3258_v22, %v251_v36  ;;  %2562 = vmatprep.subr.bf16.mxu1 %v2899_v4  ;;  %v2649_v5 = vld [vmem:[%s3862_s9 + $0x10] sm:$0xff]   ;;  %v2651_v36 = vld [vmem:[%s3862_s9] sm:$0xff]  }
 0x13f   :  { %v2689_v14 = vpop.eup %2688  ;;  %2702 = vrsqrt.f32 %v228_v6  ;;  %v309_v15 = vpack.c.bf16 %v295_v9, %v294_v43  ;;  %v275_v16 = vmul.f32 %v3258_v22, %v252_v12  ;;  %v2650_v6 = vld [vmem:[%s3862_s9 + $0x8] sm:$0xff]   ;;  %v3347_v12 = vld [vmem:[%s3864_s7] ss:$0 sm:$0xff] }
 0x140   :  { %v2691_v27 = vpop.eup %2690  ;;  %v229_v44 = vadd.f32 1e-05, %v213_v13  ;;  %v297_v31 = vadd.f32 %v3265_v28, %v274_v56  ;;  %v253_v18 = vmul.f32 %v2689_v14, %v3060_v52 }
 0x141   :  { %2491 = vmatmul.mubr.bf16.vlgmr.msra.gmra.mxu0 %v309_v15  ;;  %2523 = vmatmul.mubr.bf16.vlgmr.msra.gmra.mxu1 %v309_v15  ;;  %v254_v51 = vmul.f32 %v2691_v27, %v3069_v60  ;;  %v298_v32 = vadd.f32 %v3265_v28, %v275_v16  ;;  %v3352_v27 = vpop.permute.xlu1 %835 }
 0x142   :  { %2704 = vrsqrt.f32 %v229_v44  ;;  %v310_v19 = vpack.c.bf16 %v297_v31, %v296_v30  ;;  %v276_v21 = vmul.f32 %v3258_v22, %v253_v18  ;;  %2563 = vmatpush3.bf16.msra.mxu1 %v2648_v3 }
 0x143   :  { %v2693_v57 = vpop.eup %2692  ;;  %v277_v52 = vmul.f32 %v3258_v22, %v254_v51  ;;  %2564 = vmatprep.subr.bf16.mxu1 %v2899_v4 }
 0x144   :  { %v2695_v34 = vpop.eup %2694  ;;  %2494 = vmatprep.mubr.bf16.mxu0 %v310_v19  ;;  %2526 = vmatprep.mubr.bf16.mxu1 %v310_v19  ;;  %v299_v23 = vadd.f32 %v3265_v28, %v276_v21  ;;  %v255_v38 = vmul.f32 %v2693_v57, %v3073_v61 }
 0x145   :  { %v256_v39 = vmul.f32 %v2695_v34, %v3090_v7  ;;  %v300_v45 = vadd.f32 %v3265_v28, %v277_v52 }
 0x146   :  { %v311_v0 = vpack.c.bf16 %v299_v23, %v298_v32  ;;  %v278_v60 = vmul.f32 %v3258_v22, %v255_v38  ;;  %2565 = vmatpush3.bf16.msra.mxu1 %v2649_v5 }
 0x147   :  { %v2697_v40 = vpop.eup %2696  ;;  %v279_v41 = vmul.f32 %v3258_v22, %v256_v39  ;;  %2566 = vmatprep.subr.bf16.mxu1 %v2899_v4 }
 0x148   :  { %v2699_v42 = vpop.eup %2698  ;;  %v301_v1 = vadd.f32 %v3265_v28, %v278_v60  ;;  %v257_v46 = vmul.f32 %v2697_v40, %v3094_v8 }
 0x149   :  { %2495 = vmatmul.mubr.bf16.gmra.mxu0 %v311_v0  ;;  %2527 = vmatmul.mubr.bf16.gmra.mxu1 %v311_v0  ;;  %v258_v61 = vmul.f32 %v2699_v42, %v3108_v17  ;;  %v302_v48 = vadd.f32 %v3265_v28, %v279_v41  ;;  %v3377_v41 = vpop.permute.xlu1 %840 }
 0x14a   :  { %v312_v2 = vpack.c.bf16 %v301_v1, %v300_v45  ;;  %v280_v7 = vmul.f32 %v3258_v22, %v257_v46  ;;  %2567 = vmatpush3.bf16.msra.mxu1 %v2650_v6 }
 0x14b   :  { %v2701_v47 = vpop.eup %2700  ;;  %v281_v50 = vmul.f32 %v3258_v22, %v258_v61  ;;  %2568 = vmatprep.subr.bf16.mxu1 %v2899_v4 }
 0x14c   :  { %v2703_v25 = vpop.eup %2702  ;;  %2498 = vmatprep.mubr.bf16.mxu0 %v312_v2  ;;  %2530 = vmatprep.mubr.bf16.mxu1 %v312_v2  ;;  %v303_v49 = vadd.f32 %v3265_v28, %v280_v7  ;;  %v259_v35 = vmul.f32 %v2701_v47, %v3112_v24 }
 0x14d   :  { %v260_v8 = vmul.f32 %v2703_v25, %v3126_v20  ;;  %v304_v55 = vadd.f32 %v3265_v28, %v281_v50 }
 0x14e   :  { %v313_v53 = vpack.c.bf16 %v303_v49, %v302_v48  ;;  %v282_v17 = vmul.f32 %v3258_v22, %v259_v35  ;;  %2569 = vmatpush3.bf16.msra.mxu1 %v2651_v36 }
 0x14f   :  { %v2705_v54 = vpop.eup %2704  ;;  %v283_v58 = vmul.f32 %v3258_v22, %v260_v8 }
 0x150   :  { %v305_v26 = vadd.f32 %v3265_v28, %v282_v17  ;;  %v261_v29 = vmul.f32 %v2705_v54, %v3130_v33  ;;  %v2644_v33 = vld [vmem:[%s3861_s8 + $0x18] sm:$0xff]  }
 0x151   :  { %2499 = vmatmul.mubr.bf16.gmra.mxu0 %v313_v53  ;;  %2531 = vmatmul.mubr.bf16.gmra.mxu1 %v313_v53  ;;  %v306_v20 = vadd.f32 %v3265_v28, %v283_v58 }
 0x152   :  { %v314_v59 = vpack.c.bf16 %v305_v26, %v304_v55  ;;  %v284_v24 = vmul.f32 %v3258_v22, %v261_v29  ;;  %2538 = vmatprep.subr.bf16.mxu0 %v2644_v33  ;;  %v2646_v22 = vld [vmem:[%s3861_s8 + $0x8] sm:$0xff]   ;;  %v3409_v26 = vpop.permute.xlu1 %845 }
 0x153   :  { %2539 = vmatpush3.bf16.msra.mxu0 %v2644_v33 }
 0x154   :  { %2502 = vmatprep.mubr.bf16.mxu0 %v314_v59  ;;  %2534 = vmatprep.mubr.bf16.mxu1 %v314_v59  ;;  %v307_v62 = vadd.f32 %v3265_v28, %v284_v24  ;;  %v2647_v28 = vld [vmem:[%s3861_s8] sm:$0xff]  }
 0x155   :  { %2540 = vmatprep.subr.bf16.mxu0 %v2645_v63 }
 0x156   :  { %v315_v37 = vpack.c.bf16 %v307_v62, %v306_v20 }
 0x157   :  { %2541 = vmatpush3.bf16.msra.mxu0 %v2645_v63 }
 0x158   :  { %2542 = vmatprep.subr.bf16.mxu0 %v2646_v22 }
 0x159   :  { %2503 = vmatmul.mubr.bf16.gmra.mxu0 %v315_v37  ;;  %2535 = vmatmul.mubr.bf16.gmra.mxu1 %v315_v37 }
 0x15a   :  { %2570 = vmatprep.mubr.msk.bf16.mxu1 %vm2900_vm1, %v2899_v4 }
 0x15b   :  { %2543 = vmatpush3.bf16.msra.mxu0 %v2646_v22 }
 0x15c   :  { %2544 = vmatprep.subr.bf16.mxu0 %v2647_v28 }
 0x15f   :  { %2545 = vmatpush3.bf16.msra.mxu0 %v2647_v28  ;;  %v3416_v28 = vpop.permute.xlu1 %850 }
 0x201   :  { %v2492_v11 = vpop.f32.mrf.mxu0  ;;  %v2524_v43 = vpop.f32.mrf.mxu1 }
 0x202   :  { %v3342_v9 = vadd.f32 %v2492_v11, %v3339_v10  ;;  %v3356_v30 = vadd.f32 %v2524_v43, %v3347_v12 }
 0x203   :  { %v421_v13 = vpop.f32.mrf.mxu0  ;;  %v669_v56 = vpop.f32.mrf.mxu1 }
 0x204   :  { %v3350_v14 = vadd.f32 %v3339_v10, %v421_v13  ;;  %v502_v44 = vmul.f32 0.70710677, %v3342_v9  ;;  %v3363_v21 = vadd.f32 %v3347_v12, %v669_v56  ;;  %v750_v52 = vmul.f32 0.70710677, %v3356_v30 }
 0x205   :  { %v2493_v15 = vpop.f32.mrf.mxu0  ;;  %v2525_v16 = vpop.f32.mrf.mxu1 }
 0x206   :  { %v3359_v31 = vadd.f32 %v2493_v15, %v3339_v10  ;;  %v500_v18 = vmul.f32 0.70710677, %v3350_v14  ;;  %v748_v42 = vmul.f32 0.70710677, %v3363_v21  ;;  %v3382_v1 = vadd.f32 %v2525_v16, %v3347_v12 }
 0x207   :  { %v424_v51 = vpop.f32.mrf.mxu0  ;;  %v672_v19 = vpop.f32.mrf.mxu1  ;;  %v484_v56 = vmul.f32 0.5, %v3350_v14 }
 0x208   :  { %v503_v57 = vmul.f32 0.70710677, %v3359_v31  ;;  %2706 = verf.f32 %v500_v18  ;;  %v3367_v32 = vadd.f32 %v3339_v10, %v424_v51  ;;  %v3370_v34 = vadd.f32 %v3347_v12, %v672_v19 }
 0x209   :  { %v2496_v23 = vpop.f32.mrf.mxu0  ;;  %v2528_v38 = vpop.f32.mrf.mxu1  ;;  %2708 = verf.f32 %v502_v44  ;;  %v751_v50 = vmul.f32 0.70710677, %v3382_v1  ;;  %v487_v11 = vmul.f32 0.5, %v3359_v31  ;;  %v486_v51 = vmul.f32 0.5, %v3342_v9 }
 0x20a   :  { %v3374_v39 = vadd.f32 %v2496_v23, %v3339_v10  ;;  %2710 = verf.f32 %v503_v57  ;;  %v501_v0 = vmul.f32 0.70710677, %v3367_v32  ;;  %v749_v45 = vmul.f32 0.70710677, %v3370_v34 }
 0x20b   :  { %v437_v60 = vpop.f32.mrf.mxu0  ;;  %v685_v40 = vpop.f32.mrf.mxu1  ;;  %v3392_v48 = vadd.f32 %v2528_v38, %v3347_v12  ;;  %v485_v15 = vmul.f32 0.5, %v3367_v32  ;;  %v734_v31 = vmul.f32 0.5, %v3356_v30  ;;  %v732_v32 = vmul.f32 0.5, %v3363_v21 }
 0x20c   :  { %2712 = verf.f32 %v501_v0  ;;  %v506_v46 = vmul.f32 0.70710677, %v3374_v39  ;;  %v3386_v61 = vadd.f32 %v3339_v10, %v437_v60  ;;  %v3397_v8 = vadd.f32 %v3347_v12, %v685_v40 }
 0x20d   :  { %v2497_v2 = vpop.f32.mrf.mxu0  ;;  %v2529_v7 = vpop.f32.mrf.mxu1  ;;  %2714 = verf.f32 %v750_v52  ;;  %v754_v29 = vmul.f32 0.70710677, %v3392_v48  ;;  %v3432_v40 = vmul.f32 0.5, %v3382_v1  ;;  %v733_v21 = vmul.f32 0.5, %v3370_v34 }
 0x20e   :  { %v3389_v47 = vadd.f32 %v2497_v2, %v3339_v10  ;;  %2716 = verf.f32 %v749_v45  ;;  %v504_v25 = vmul.f32 0.70710677, %v3386_v61  ;;  %v3401_v17 = vadd.f32 %v2529_v7, %v3347_v12 }
 0x20f   :  { %v440_v49 = vpop.f32.mrf.mxu0  ;;  %v688_v35 = vpop.f32.mrf.mxu1  ;;  %2718 = verf.f32 %v748_v42  ;;  %v752_v59 = vmul.f32 0.70710677, %v3397_v8  ;;  %v490_v1 = vmul.f32 0.5, %v3374_v39 }
 0x210   :  { %2720 = verf.f32 %v506_v46  ;;  %v507_v53 = vmul.f32 0.70710677, %v3389_v47  ;;  %v3404_v54 = vadd.f32 %v3339_v10, %v440_v49  ;;  %v3407_v55 = vadd.f32 %v3347_v12, %v688_v35  ;;  %v3437_v46 = vpop.permute.xlu1 %855 }
 0x211   :  { %2722 = verf.f32 %v504_v25  ;;  %v755_v62 = vmul.f32 0.70710677, %v3401_v17  ;;  %v2500_v37 = vpop.f32.mrf.mxu0  ;;  %v2532_v33 = vpop.f32.mrf.mxu1 }
 0x212   :  { %2724 = verf.f32 %v507_v53  ;;  %v505_v58 = vmul.f32 0.70710677, %v3404_v54  ;;  %v753_v24 = vmul.f32 0.70710677, %v3407_v55  ;;  %v3419_v5 = vadd.f32 %v2532_v33, %v3347_v12 }
 0x213   :  { %2726 = verf.f32 %v751_v50  ;;  %v453_v43 = vpop.f32.mrf.mxu0  ;;  %v3425_v44 = vadd.f32 %v2500_v37, %v3339_v10  ;;  %v701_v57 = vpop.f32.mrf.mxu1  ;;  %v738_v50 = vmul.f32 0.5, %v3392_v48  ;;  %v491_v37 = vmul.f32 0.5, %v3389_v47 }
 0x214   :  { %2728 = verf.f32 %v505_v58  ;;  %v758_v0 = vmul.f32 0.70710677, %v3419_v5  ;;  %v3435_v42 = vadd.f32 %v3339_v10, %v453_v43  ;;  %v3441_v25 = vadd.f32 %v3347_v12, %v701_v57 }
 0x215   :  { %v2707_v20 = vpop.eup %2706  ;;  %2730 = verf.f32 %v754_v29  ;;  %v2501_v9 = vpop.f32.mrf.mxu0  ;;  %v510_v7 = vmul.f32 0.70710677, %v3425_v44 }
 0x216   :  { %v2709_v63 = vpop.eup %2708  ;;  %2732 = verf.f32 %v753_v24  ;;  %v532_v3 = vadd.f32 1.0, %v2707_v20  ;;  %v3447_v58 = vadd.f32 %v2501_v9, %v3339_v10  ;;  %v508_v34 = vmul.f32 0.70710677, %v3435_v42 }
 0x217   :  { %v2711_v22 = vpop.eup %2710  ;;  %2734 = verf.f32 %v752_v59  ;;  %v534_v36 = vadd.f32 1.0, %v2709_v63  ;;  %v2533_v59 = vpop.f32.mrf.mxu1  ;;  %v756_v63 = vmul.f32 0.70710677, %v3441_v25 }
 0x218   :  { %v535_v4 = vadd.f32 1.0, %v2711_v22  ;;  %2736 = verf.f32 %v755_v62  ;;  %v548_v38 = vmul.f32 %v532_v3, %v484_v56  ;;  %v488_v3 = vmul.f32 0.5, %v3386_v61  ;;  %v456_v61 = vpop.f32.mrf.mxu0 }
 0x219   :  { %v2713_v6 = vpop.eup %2712  ;;  %v550_v60 = vmul.f32 %v534_v36, %v486_v51  ;;  %2738 = verf.f32 %v758_v0  ;;  %v3457_v36 = vadd.f32 %v2533_v59, %v3347_v12  ;;  %v737_v56 = vmul.f32 0.5, %v3407_v55  ;;  %v704_v57 = vpop.f32.mrf.mxu1 }
 0x21a   :  { %v2715_v13 = vpop.eup %2714  ;;  %v533_v16 = vadd.f32 1.0, %v2713_v6  ;;  %v551_v19 = vmul.f32 %v535_v4, %v487_v11  ;;  %2740 = verf.f32 %v510_v7  ;;  %v489_v4 = vmul.f32 0.5, %v3404_v54  ;;  %v861_v11 = vpop.permute.xlu1 %860 }
 0x21b   :  { %v2717_v18 = vpop.eup %2716  ;;  %v782_v20 = vadd.f32 1.0, %v2715_v13  ;;  %2742 = verf.f32 %v508_v34  ;;  %v831_v0 = vpop.permute.xlu0 %830  ;;  %v759_v55 = vmul.f32 0.70710677, %v3457_v36  ;;  %v3467_v7 = vadd.f32 %v3347_v12, %v704_v57 }
 0x21c   :  { %v2719_v23 = vpop.eup %2718  ;;  %v549_v52 = vmul.f32 %v533_v16, %v485_v15  ;;  %v781_v30 = vadd.f32 1.0, %v2717_v18  ;;  %v1135_v35 = vpack.c.bf16 %v551_v19, %v550_v60  ;;  %v511_v15 = vmul.f32 0.70710677, %v3447_v58 }
 0x21d   :  { %v2721_v14 = vpop.eup %2720  ;;  %v780_v53 = vadd.f32 1.0, %v2719_v23  ;;  %v798_v18 = vmul.f32 %v782_v20, %v734_v31  ;;  %2744 = verf.f32 %v756_v63  ;;  %v3464_v31 = vadd.f32 %v3339_v10, %v456_v61 }
 0x21e   :  { %v2723_v45 = vpop.eup %2722  ;;  %v1134_v2 = vpack.c.bf16 %v549_v52, %v548_v38  ;;  %v797_v48 = vmul.f32 %v781_v30, %v733_v21  ;;  %v538_v33 = vadd.f32 1.0, %v2721_v14  ;;  %2746 = verf.f32 %v511_v15 }
 0x21f   :  { %v2725_v49 = vpop.eup %2724  ;;  %v536_v62 = vadd.f32 1.0, %v2723_v45  ;;  %v796_v43 = vmul.f32 %v780_v53, %v732_v32  ;;  %2748 = verf.f32 %v759_v55  ;;  %v736_v53 = vmul.f32 0.5, %v3397_v8  ;;  %v876_v55 = vpop.permute.xlu0 %875 }
 0x220   :  { %v539_v29 = vadd.f32 1.0, %v2725_v49  ;;  %2546 = vmatprep.mubr.msk.bf16.mxu0 %vm924_vm2, %v1134_v2  ;;  %v2727_v24 = vpop.eup %2726  ;;  %v909_v38 = vmul.f32 %v3352_v27, %v797_v48  ;;  %v554_v52 = vmul.f32 %v538_v33, %v490_v1  ;;  %v2504_v27 = vpop.f32.mrf.mxu0  ;;  %v739_v59 = vmul.f32 0.5, %v3401_v17 }
 0x221   :  { %2547 = vmatmul.mubr.msk.bf16.vlgmr.msra.gmra.mxu0 %vm924_vm2, %v1135_v35  ;;  %v2729_v39 = vpop.eup %2728  ;;  %v552_v51 = vmul.f32 %v536_v62, %v488_v3  ;;  %v783_v23 = vadd.f32 1.0, %v2727_v24  ;;  %v908_v9 = vmul.f32 %v831_v0, %v796_v43  ;;  %v2536_v49 = vpop.f32.mrf.mxu1  ;;  %v509_v20 = vmul.f32 0.70710677, %v3464_v31 }
 0x222   :  { %v2731_v22 = vpop.eup %2730  ;;  %v537_v6 = vadd.f32 1.0, %v2729_v39  ;;  %v555_v13 = vmul.f32 %v539_v29, %v491_v37  ;;  %v866_v35 = vpop.permute.xlu1 %865  ;;  %v926_v1 = vsel %vm924_vm2, %v909_v38, 0.0  ;;  %v910_v62 = vmul.f32 %v3377_v41, %v798_v18 }
 0x223   :  { %v2733_v47 = vpop.eup %2732  ;;  %v786_v14 = vadd.f32 1.0, %v2731_v22  ;;  %v799_v21 = vmul.f32 %v783_v23, %v3432_v40  ;;  %v925_v37 = vsel %vm924_vm2, %v908_v9, 0.0  ;;  %v494_v34 = vmul.f32 0.5, %v3425_v44  ;;  %v469_v63 = vpop.f32.mrf.mxu0 }
 0x224   :  { %v2735_v16 = vpop.eup %2734  ;;  %v553_v19 = vmul.f32 %v537_v6, %v489_v4  ;;  %v785_v32 = vadd.f32 1.0, %v2733_v47  ;;  %v1137_v45 = vpack.c.bf16 %v555_v13, %v554_v52  ;;  %v757_v40 = vmul.f32 0.70710677, %v3467_v7 }
 0x225   :  { %v2737_v54 = vpop.eup %2736  ;;  %v784_v2 = vadd.f32 1.0, %v2735_v16  ;;  %v802_v29 = vmul.f32 %v786_v14, %v738_v50  ;;  %v927_v48 = vadd.f32 %v926_v1, %v925_v37  ;;  %2750 = verf.f32 %v509_v20  ;;  %v717_v50 = vpop.f32.mrf.mxu1 }
 0x226   :  { %v1136_v60 = vpack.c.bf16 %v553_v19, %v552_v51  ;;  %v787_v30 = vadd.f32 1.0, %v2737_v54  ;;  %v801_v24 = vmul.f32 %v785_v32, %v737_v56  ;;  %v2739_v39 = vpop.eup %2738  ;;  %v911_v17 = vmul.f32 %v3409_v26, %v799_v21  ;;  %v3490_v43 = vpop.permute.xlu1 %870 }
 0x227   :  { %v800_v33 = vmul.f32 %v784_v2, %v736_v53  ;;  %v742_v22 = vmul.f32 0.5, %v3419_v5  ;;  %2752 = verf.f32 %v757_v40  ;;  %v3483_v41 = vadd.f32 %v2536_v49, %v3347_v12  ;;  %v2741_v3 = vpop.eup %2740  ;;  %v2537_v18 = vpop.f32.mrf.mxu1 }
 0x228   :  { %2550 = vmatprep.mubr.msk.bf16.mxu0 %vm924_vm2, %v1136_v60  ;;  %v803_v8 = vmul.f32 %v787_v30, %v739_v59  ;;  %v914_v4 = vmul.f32 %v861_v11, %v802_v29  ;;  %v913_v44 = vmul.f32 %v3437_v46, %v801_v24  ;;  %v492_v6 = vmul.f32 0.5, %v3435_v42  ;;  %v2505_v42 = vpop.f32.mrf.mxu0  ;;  %v2743_v51 = vpop.eup %2742 }
 0x229   :  { %2551 = vmatmul.mubr.msk.bf16.gmra.mxu0 %vm924_vm2, %v1137_v45  ;;  %v3488_v47 = vadd.f32 %v2504_v27, %v3339_v10  ;;  %v934_v13 = vsel %vm924_vm2, %v910_v62, 0.0  ;;  %v790_v26 = vadd.f32 1.0, %v2739_v39  ;;  %v762_v5 = vmul.f32 0.70710677, %v3483_v41 }
 0x22a   :  { %v3495_v56 = vadd.f32 %v3339_v10, %v469_v63  ;;  %v928_v15 = vrot.slane %v927_v48, 4  ;;  %v912_v11 = vmul.f32 %v3416_v28, %v800_v33  ;;  %v915_v16 = vmul.f32 %v866_v35, %v803_v8  ;;  %v2745_v54 = vpop.eup %2744  ;;  %v472_v1 = vpop.f32.mrf.mxu0 }
 0x22b   :  { %v740_v46 = vmul.f32 0.5, %v3441_v25  ;;  %v935_v19 = vsel %vm924_vm2, %v911_v17, 0.0  ;;  %v542_v61 = vadd.f32 1.0, %v2741_v3  ;;  %v495_v57 = vmul.f32 0.5, %v3447_v58  ;;  %v2747_v58 = vpop.eup %2746  ;;  %v881_v53 = vpop.permute.xlu1 %880 }
 0x22c   :  { %2754 = verf.f32 %v762_v5  ;;  %v952_v23 = vsel %vm924_vm2, %v914_v4, 0.0  ;;  %v944_v38 = vsel %vm924_vm2, %v913_v44, 0.0  ;;  %v514_v52 = vmul.f32 0.70710677, %v3488_v47  ;;  %v2749_v30 = vpop.eup %2748  ;;  %v720_v63 = vpop.f32.mrf.mxu1 }
 0x22d   :  { %v3505_v28 = vadd.f32 %v3347_v12, %v717_v50  ;;  %v806_v25 = vmul.f32 %v790_v26, %v742_v22  ;;  %v512_v0 = vmul.f32 0.70710677, %v3495_v56  ;;  %v3509_v14 = vadd.f32 %v2505_v42, %v3339_v10  ;;  %v886_v17 = vpop.permute.xlu0 %885 }
 0x22e   :  { %v3512_v60 = vadd.f32 %v2537_v18, %v3347_v12  ;;  %v3514_v32 = vadd.f32 %v928_v15, %v927_v48  ;;  %v943_v9 = vsel %vm924_vm2, %v912_v11, 0.0  ;;  %v953_v45 = vsel %vm924_vm2, %v915_v16, 0.0 }
 0x22f   :  { %v743_v2 = vmul.f32 0.5, %v3457_v36  ;;  %v945_v27 = vadd.f32 %v944_v38, %v943_v9  ;;  %v558_v49 = vmul.f32 %v542_v61, %v494_v34  ;;  %v788_v35 = vadd.f32 1.0, %v2745_v54 }
 0x230   :  { %v515_v21 = vmul.f32 0.70710677, %v3509_v14  ;;  %v540_v29 = vadd.f32 1.0, %v2743_v51  ;;  %v791_v59 = vadd.f32 1.0, %v2749_v30  ;;  %2756 = verf.f32 %v514_v52 }
 0x231   :  { %v760_v24 = vmul.f32 0.70710677, %v3505_v28  ;;  %v918_v20 = vmul.f32 %v881_v53, %v806_v25  ;;  %v543_v62 = vadd.f32 1.0, %v2747_v58  ;;  %2758 = verf.f32 %v512_v0  ;;  %v3539_v52 = vpop.permute.xlu0 %895 }
 0x232   :  { %v763_v37 = vmul.f32 0.70710677, %v3512_v60  ;;  %v807_v40 = vmul.f32 %v791_v59, %v743_v2  ;;  %v936_v36 = vadd.f32 %v935_v19, %v934_v13  ;;  %2760 = verf.f32 %v515_v21  ;;  %v2751_v39 = vpop.eup %2750 }
 0x233   :  { %v3523_v34 = vadd.f32 %v3339_v10, %v472_v1  ;;  %v946_v48 = vrot.slane %v945_v27, 4  ;;  %v804_v33 = vmul.f32 %v788_v35, %v740_v46  ;;  %v493_v8 = vmul.f32 0.5, %v3464_v31 }
 0x234   :  { %2762 = verf.f32 %v763_v37  ;;  %v2753_v50 = vpop.eup %2752  ;;  %v556_v22 = vmul.f32 %v540_v29, %v492_v6  ;;  %v541_v3 = vadd.f32 1.0, %v2751_v39  ;;  %v741_v4 = vmul.f32 0.5, %v3467_v7 }
 0x235   :  { %2764 = verf.f32 %v760_v24  ;;  %v559_v44 = vmul.f32 %v543_v62, %v495_v57  ;;  %v919_v13 = vmul.f32 %v886_v17, %v807_v40  ;;  %v789_v26 = vadd.f32 1.0, %v2753_v50  ;;  %v3534_v57 = vpop.permute.xlu1 %890 }
 0x236   :  { %v513_v10 = vmul.f32 0.70710677, %v3523_v34  ;;  %v557_v5 = vmul.f32 %v541_v3, %v493_v8  ;;  %v937_v15 = vrot.slane %v936_v36, 4  ;;  %v954_v11 = vadd.f32 %v953_v45, %v952_v23 }
 0x237   :  { %v3529_v16 = vadd.f32 %v3347_v12, %v720_v63  ;;  %v947_v31 = vadd.f32 %v946_v48, %v945_v27  ;;  %v916_v46 = vmul.f32 %v3490_v43, %v804_v33  ;;  %v805_v42 = vmul.f32 %v789_v26, %v741_v4 }
 0x238   :  { %2766 = verf.f32 %v513_v10  ;;  %v930_v7 = vrot.slane %v3514_v32, 2  ;;  %v1138_v18 = vpack.c.bf16 %v557_v5, %v556_v22  ;;  %v1139_v51 = vpack.c.bf16 %v559_v44, %v558_v49 }
 0x239   :  { %v2755_v6 = vpop.eup %2754  ;;  %v971_v19 = vsel %vm924_vm2, %v919_v13, 0.0  ;;  %v917_v61 = vmul.f32 %v876_v55, %v805_v42  ;;  %v970_v54 = vsel %vm924_vm2, %v918_v20, 0.0  ;;  %v938_v23 = vadd.f32 %v937_v15, %v936_v36  ;;  %v901_v24 = vpop.permute.xlu1 %900 }
 0x23a   :  { %v955_v12 = vrot.slane %v954_v11, 4  ;;  %v761_v38 = vmul.f32 0.70710677, %v3529_v16  ;;  %2554 = vmatprep.mubr.msk.bf16.mxu0 %vm924_vm2, %v1138_v18  ;;  %v948_v43 = vrot.slane %v947_v31, 2  ;;  %v961_v25 = vsel %vm924_vm2, %v916_v46, 0.0 }
 0x23b   :  { %v962_v0 = vsel %vm924_vm2, %v917_v61, 0.0  ;;  %v794_v58 = vadd.f32 1.0, %v2755_v6  ;;  %2555 = vmatmul.mubr.msk.bf16.gmra.mxu0 %vm924_vm2, %v1139_v51  ;;  %v931_v55 = vadd.f32 %v930_v7, %v3514_v32  ;;  %v972_v45 = vadd.f32 %v971_v19, %v970_v54  ;;  %v906_v32 = vpop.permute.xlu0 %905 }
 0x23c   :  { %v963_v9 = vadd.f32 %v962_v0, %v961_v25  ;;  %2768 = verf.f32 %v761_v38  ;;  %v746_v30 = vmul.f32 0.5, %v3483_v41  ;;  %v939_v35 = vrot.slane %v938_v23, 2 }
 0x23d   :  { %v2757_v2 = vpop.eup %2756  ;;  %v956_v21 = vadd.f32 %v955_v12, %v954_v11  ;;  %v949_v53 = vadd.f32 %v948_v43, %v947_v31  ;;  %v932_v20 = vrot.slane %v931_v55, 1  ;;  %v973_v37 = vrot.slane %v972_v45, 4  ;;  %v1081_v11 = vpop.permute.xlu1 %1080 }
 0x23e   :  { %v2759_v27 = vpop.eup %2758  ;;  %v964_v49 = vrot.slane %v963_v9, 4  ;;  %v810_v29 = vmul.f32 %v794_v58, %v746_v30  ;;  %v498_v36 = vmul.f32 0.5, %v3488_v47  ;;  %v496_v39 = vmul.f32 0.5, %v3495_v56 }
 0x23f   :  { %v2761_v1 = vpop.eup %2760  ;;  %v747_v41 = vmul.f32 0.5, %v3512_v60  ;;  %v940_v33 = vadd.f32 %v939_v35, %v938_v23  ;;  %v544_v8 = vadd.f32 1.0, %v2759_v27  ;;  %v957_v50 = vrot.slane %v956_v21, 2  ;;  %v1086_v51 = vpop.permute.xlu0 %1085 }
 0x240   :  { %v965_v62 = vadd.f32 %v964_v49, %v963_v9  ;;  %v547_v63 = vadd.f32 1.0, %v2761_v1  ;;  %v950_v17 = vrot.slane %v949_v53, 1  ;;  %v922_v3 = vmul.f32 %v901_v24, %v810_v29 }
 0x241   :  { %v2763_v59 = vpop.eup %2762  ;;  %v546_v13 = vadd.f32 1.0, %v2757_v2  ;;  %v499_v10 = vmul.f32 0.5, %v3509_v14  ;;  %v974_v5 = vadd.f32 %v973_v37, %v972_v45  ;;  %v744_v47 = vmul.f32 0.5, %v3505_v28  ;;  %v1091_v27 = vpop.permute.xlu1 %1090 }
 0x242   :  { %v2765_v40 = vpop.eup %2764  ;;  %v795_v48 = vadd.f32 1.0, %v2763_v59  ;;  %v966_v22 = vrot.slane %v965_v62, 2  ;;  %v497_v60 = vmul.f32 0.5, %v3523_v34  ;;  %v941_v31 = vrot.slane %v940_v33, 1 }
 0x243   :  { %v792_v26 = vadd.f32 1.0, %v2765_v40  ;;  %v560_v46 = vmul.f32 %v544_v8, %v496_v39  ;;  %v563_v42 = vmul.f32 %v547_v63, %v499_v10  ;;  %v958_v6 = vadd.f32 %v957_v50, %v956_v21 }
 0x244   :  { %v811_v4 = vmul.f32 %v795_v48, %v747_v41  ;;  %v967_v7 = vadd.f32 %v966_v22, %v965_v62  ;;  %v988_v18 = vsel %vm924_vm2, %v922_v3, 0.0  ;;  %v562_v14 = vmul.f32 %v546_v13, %v498_v36 }
 0x245   :  { %v2767_v44 = vpop.eup %2766  ;;  %v808_v54 = vmul.f32 %v792_v26, %v744_v47  ;;  %v975_v23 = vrot.slane %v974_v5, 2  ;;  %v933_v38 = vadd.f32 %v932_v20, %v931_v55  ;;  %v745_v25 = vmul.f32 0.5, %v3529_v16  ;;  %v1096_v55 = vpop.permute.xlu0 %1095 }
 0x246   :  { %v923_v56 = vmul.f32 %v906_v32, %v811_v4  ;;  %v545_v15 = vadd.f32 1.0, %v2767_v44  ;;  %v1141_v43 = vpack.c.bf16 %v563_v42, %v562_v14  ;;  %v951_v9 = vadd.f32 %v950_v17, %v949_v53  ;;  %v1101_v39 = vpop.permute.xlu1 %1100 }
 0x247   :  { %v968_v45 = vrot.slane %v967_v7, 1  ;;  %v942_v2 = vadd.f32 %v941_v31, %v940_v33  ;;  %v959_v30 = vrot.slane %v958_v6, 1  ;;  %v920_v49 = vmul.f32 %v3534_v57, %v808_v54 }
 0x248   :  { %v989_v19 = vsel %vm924_vm2, %v923_v56, 0.0  ;;  %v561_v61 = vmul.f32 %v545_v15, %v497_v60  ;;  %v976_v21 = vadd.f32 %v975_v23, %v974_v5  ;;  %v1118_v29 = vmul.f32 %v1081_v11, %v933_v38 }
 0x249   :  { %v990_v28 = vadd.f32 %v989_v19, %v988_v18  ;;  %v2769_v12 = vpop.eup %2768  ;;  %v969_v24 = vadd.f32 %v968_v45, %v967_v7  ;;  %v1119_v53 = vmul.f32 %v1086_v51, %v942_v2  ;;  %v960_v20 = vadd.f32 %v959_v30, %v958_v6  ;;  %v1106_v50 = vpop.permute.xlu0 %1105 }
 0x24a   :  { %v1140_v34 = vpack.c.bf16 %v561_v61, %v560_v46  ;;  %v793_v0 = vadd.f32 1.0, %v2769_v12  ;;  %v1120_v62 = vmul.f32 %v1091_v27, %v951_v9  ;;  %v979_v37 = vsel %vm924_vm2, %v920_v49, 0.0  ;;  %v1111_v61 = vpop.permute.xlu1 %1110 }
 0x24b   :  { %v991_v58 = vrot.slane %v990_v28, 4  ;;  %v977_v32 = vrot.slane %v976_v21, 1  ;;  %v1126_v41 = vadd.f32 1e-06, %v1118_v29  ;;  %v1122_v63 = vmul.f32 %v1101_v39, %v969_v24  ;;  %v2654_v29 = vld [vmem:[%s3865_s11 + $0x8] sm:$0xff]  }
 0x24c   :  { %2558 = vmatprep.mubr.msk.bf16.mxu0 %vm924_vm2, %v1140_v34  ;;  %v809_v35 = vmul.f32 %v793_v0, %v745_v25  ;;  %v1128_v33 = vadd.f32 1e-06, %v1120_v62  ;;  %v1121_v17 = vmul.f32 %v1096_v55, %v960_v20  ;;  %v2653_v55 = vld [vmem:[%s3865_s11 + $0x10] sm:$0xff]   ;;  %v1414_v39 = vlaneseq }
 0x24d   :  { %v992_v1 = vadd.f32 %v991_v58, %v990_v28  ;;  %2559 = vmatmul.mubr.msk.bf16.gmra.mxu0 %vm924_vm2, %v1141_v43  ;;  %v978_v22 = vadd.f32 %v977_v32, %v976_v21  ;;  %v1295_v4 = vpack.c.bf16 %v1126_v41, %v1126_v41  ;;  %v1130_v10 = vadd.f32 1e-06, %v1122_v63  ;;  %v1116_v15 = vpop.permute.xlu0 %1115 }
 0x24e   :  { %v921_v16 = vmul.f32 %v3539_v52, %v809_v35  ;;  %v1127_v52 = vadd.f32 1e-06, %v1119_v53  ;;  %v1297_v13 = vpack.c.bf16 %v1128_v33, %v1128_v33  ;;  %v1129_v47 = vadd.f32 1e-06, %v1121_v17 }
 0x24f   :  { %v993_v59 = vrot.slane %v992_v1, 2  ;;  %v1123_v56 = vmul.f32 %v1106_v50, %v978_v22  ;;  %v1319_v11 = vunpack.c.l.b16 %v1295_v4  ;;  %v1299_v6 = vpack.c.bf16 %v1130_v10, %v1130_v10 }
 0x250   :  { %v980_v40 = vsel %vm924_vm2, %v921_v16, 0.0  ;;  %v1296_v5 = vpack.c.bf16 %v1127_v52, %v1127_v52  ;;  %v1321_v46 = vunpack.c.l.b16 %v1297_v13  ;;  %v1298_v18 = vpack.c.bf16 %v1129_v47, %v1129_v47  ;;  %v2655_v16 = vld [vmem:[%s3865_s11] sm:$0xff]  }
 0x251   :  { %v994_v57 = vadd.f32 %v993_v59, %v992_v1  ;;  %v981_v36 = vadd.f32 %v980_v40, %v979_v37  ;;  %v1131_v51 = vadd.f32 1e-06, %v1123_v56  ;;  %v1323_v28 = vunpack.c.l.b16 %v1299_v6  ;;  %v2652_v1 = vld [vmem:[%s3865_s11 + $0x18] sm:$0xff]  }
 0x252   :  { %v1320_v7 = vunpack.c.l.b16 %v1296_v5  ;;  %v1322_v38 = vunpack.c.l.b16 %v1298_v18  ;;  %2574 = vmatprep.subr.bf16.mxu1 %v2652_v1  ;;  %v1415_v33 = vshrl.u32 %v1414_v39, 7 }
 0x253   :  { %v995_v48 = vrot.slane %v994_v57, 1  ;;  %v982_v8 = vrot.slane %v981_v36, 4  ;;  %v1300_v34 = vpack.c.bf16 %v1131_v51, %v1131_v51 }
 0x254   :  { %v1328_v14 = vsel %vm1327_vm3, %v1320_v7, %v1319_v11 }
 0x255   :  { %v983_v3 = vadd.f32 %v982_v8, %v981_v36  ;;  %v996_v44 = vadd.f32 %v995_v48, %v994_v57  ;;  %v1330_v23 = vsel %vm1329_vm4, %v1321_v46, %v1328_v14  ;;  %v1324_v45 = vunpack.c.l.b16 %v1300_v34 }
 0x256   :  { %v1332_v25 = vsel %vm1331_vm5, %v1322_v38, %v1330_v23  ;;  %v2901_v57 = vmov 1966171168   ;;  %v2338_v38 = vld [vmem:[%s3866_s10] ss:$0 sm:$0xff] }
 0x257   :  { %v984_v26 = vrot.slane %v983_v3, 2  ;;  %v1125_v31 = vmul.f32 %v1116_v15, %v996_v44  ;;  %v1334_v58 = vsel %vm1333_vm6, %v1323_v28, %v1332_v25  ;;  %v1412_v36 = vunpack.c.l.s4 %v2901_v57 }
 0x258   :  { %v1336_v30 = vsel %vm1335_vm7, %v1324_v45, %v1334_v58 }
 0x259   :  { %v985_v60 = vadd.f32 %v984_v26, %v983_v3  ;;  %v1133_v54 = vadd.f32 1e-06, %v1125_v31  ;;  %v1413_v48 = vunpack.c.0.s8 %v1412_v36  ;;  %v1461_v3 = vsub.s32 0, %v1415_v33 }
 0x25b   :  { %v986_v42 = vrot.slane %v985_v60, 1  ;;  %v1302_v0 = vpack.c.bf16 %v1133_v54, %v1133_v54  ;;  %v1416_v63 = vsub.s32 %v1413_v48, %v1415_v33 }
 0x25d   :  { %v987_v19 = vadd.f32 %v986_v42, %v985_v60  ;;  %v1326_v27 = vunpack.c.l.b16 %v1302_v0 }
 0x25f   :  { %v1124_v12 = vmul.f32 %v1111_v61, %v987_v19 }
 0x261   :  { %v1132_v43 = vadd.f32 1e-06, %v1124_v12 }
 0x263   :  { %v1301_v9 = vpack.c.bf16 %v1132_v43, %v1132_v43 }
 0x265   :  { %v1325_v2 = vunpack.c.l.b16 %v1301_v9 }
 0x267   :  { %v1338_v49 = vsel %vm1337_vm8, %v1325_v2, %v1336_v30 }
 0x268   :  { %v1340_v35 = vsel %vm1339_vm9, %v1326_v27, %v1338_v49 }
 0x269   :  { %v1341_v21 = vpack.c.b16 %v1340_v35, %v1340_v35 }
 0x26b   :  { %2571 = vmatmul.mubr.msk.bf16.vlgmr.msra.gmra.mxu1 %vm924_vm2, %v1341_v21 }
 0x26c   :  { %2575 = vmatpush3.bf16.msra.mxu1 %v2652_v1 }
 0x26d   :  { %2576 = vmatprep.subr.bf16.mxu1 %v2653_v55 }
 0x270   :  { %2577 = vmatpush3.bf16.msra.mxu1 %v2653_v55 }
 0x271   :  { %2578 = vmatprep.subr.bf16.mxu1 %v2654_v29 }
 0x274   :  { %2579 = vmatpush3.bf16.msra.mxu1 %v2654_v29 }
 0x275   :  { %2580 = vmatprep.subr.bf16.mxu1 %v2655_v16 }
 0x278   :  { %2581 = vmatpush3.bf16.msra.mxu1 %v2655_v16 }
 0x2e1   :  { %v2548_v59 = vpop.f32.mrf.mxu0 }
 0x2e3   :  { %v1232_v24 = vpop.f32.mrf.mxu0 }
 0x2e5   :  { %v2549_v53 = vpop.f32.mrf.mxu0 }
 0x2e7   :  { %v1235_v20 = vpop.f32.mrf.mxu0 }
 0x2e9   :  { %v2552_v62 = vpop.f32.mrf.mxu0 }
 0x2eb   :  { %v1248_v37 = vpop.f32.mrf.mxu0 }
 0x2ed   :  { %v2553_v40 = vpop.f32.mrf.mxu0 }
 0x2ef   :  { %v1251_v32 = vpop.f32.mrf.mxu0 }
 0x2fb   :  { %v2556_v41 = vpop.f32.mrf.mxu0 }
 0x2fd   :  { %v1264_v8 = vpop.f32.mrf.mxu0 }
 0x2ff   :  { %v2557_v50 = vpop.f32.mrf.mxu0 }
 0x301   :  { %v1267_v10 = vpop.f32.mrf.mxu0 }
 0x30d   :  { %v2560_v6 = vpop.f32.mrf.mxu0 }
 0x30f   :  { %v1280_v25 = vpop.f32.mrf.mxu0 }
 0x32b   :  { %v1403_v52 = vpop.f32.mrf.mxu1 }
 0x32c   :  { %v1410_v17 = vcombine.high %v1403_v52, %v1403_v52  ;;  %v1417_v22 = vrot.slane %v1403_v52, %v1416_v63 }
 0x32d   :  { %v2572_v4 = vpop.f32.mrf.mxu1 }
 0x32e   :  { %v1424_v44 = vrot.slane %v1410_v17, %v1416_v63  ;;  %v1425_v13 = vcombine.high %v1417_v22, %v1417_v22  ;;  %v1433_v26 = vrot.slane %v1417_v22, %v1416_v63 }
 0x32f   :  { %v1406_v5 = vpop.f32.mrf.mxu1 }
 0x330   :  { %v1426_v47 = vcombine.high %v1424_v44, %v1424_v44  ;;  %v1440_v56 = vrot.slane %v1424_v44, %v1416_v63  ;;  %v1447_v60 = vrot.slane %v1425_v13, %v1416_v63  ;;  %v1455_v15 = vcombine.high %v1433_v26, %v1433_v26 }
 0x331   :  { %v1462_v11 = vrot.slane %v1433_v26, %v1461_v3  ;;  %v2573_v31 = vpop.f32.mrf.mxu1 }
 0x332   :  { %v1457_v46 = vcombine.high %v1447_v60, %v1447_v60  ;;  %v1466_v42 = vrot.slane %v1447_v60, %v1461_v3  ;;  %v1454_v7 = vrot.slane %v1426_v47, %v1416_v63  ;;  %v1470_v18 = vrot.slane %v1455_v15, %v1461_v3 }
 0x333   :  { %v1478_v51 = vrot.slane %v1440_v56, %v1461_v3  ;;  %v1456_v19 = vcombine.high %v1440_v56, %v1440_v56  ;;  %v1499_v14 = vadd.f32 %v1462_v11, %v1232_v24  ;;  %v1500_v54 = vadd.f32 %v1462_v11, %v1235_v20 }
 0x334   :  { %v1474_v61 = vrot.slane %v1457_v46, %v1461_v3  ;;  %v1501_v23 = vadd.f32 %v2548_v59, %v1466_v42  ;;  %v1502_v28 = vadd.f32 %v2549_v53, %v1466_v42  ;;  %v1503_v12 = vadd.f32 %v1470_v18, %v1248_v37  ;;  %v2561_v59 = vpop.f32.mrf.mxu0 }
 0x335   :  { %v1504_v34 = vadd.f32 %v1470_v18, %v1251_v32  ;;  %v1507_v43 = vadd.f32 %v1478_v51, %v1264_v8  ;;  %v1482_v0 = vrot.slane %v1454_v7, %v1461_v3  ;;  %v1508_v58 = vadd.f32 %v1478_v51, %v1267_v10 }
 0x336   :  { %v1458_v9 = vcombine.high %v1454_v7, %v1454_v7  ;;  %v1486_v45 = vrot.slane %v1456_v19, %v1461_v3  ;;  %v1505_v2 = vadd.f32 %v2552_v62, %v1474_v61  ;;  %v1522_v30 = vadd.f32 %v2338_v38, %v1499_v14  ;;  %v1283_v8 = vpop.f32.mrf.mxu0 }
 0x337   :  { %v1523_v27 = vadd.f32 %v2338_v38, %v1500_v54  ;;  %v1524_v49 = vadd.f32 %v2338_v38, %v1501_v23  ;;  %v3578_v35 = vadd.f32 %v2338_v38, %v1502_v28  ;;  %v3580_v21 = vadd.f32 %v2338_v38, %v1503_v12 }
 0x338   :  { %v1506_v1 = vadd.f32 %v2553_v40, %v1474_v61  ;;  %v3582_v55 = vadd.f32 %v2338_v38, %v1504_v34  ;;  %v3584_v29 = vadd.f32 %v2338_v38, %v1507_v43  ;;  %v1554_v16 = vmul.f32 0.70710677, %v1522_v30 }
 0x339   :  { %v1509_v24 = vadd.f32 %v2556_v41, %v1482_v0  ;;  %v3586_v53 = vadd.f32 %v2338_v38, %v1508_v58  ;;  %v1555_v20 = vmul.f32 0.70710677, %v1523_v27  ;;  %v1556_v37 = vmul.f32 0.70710677, %v1524_v49 }
 0x33a   :  { %v1510_v62 = vadd.f32 %v2557_v50, %v1482_v0  ;;  %v1557_v32 = vmul.f32 0.70710677, %v3578_v35  ;;  %v1558_v57 = vmul.f32 0.70710677, %v3580_v21  ;;  %2770 = verf.f32 %v1554_v16 }
 0x33b   :  { %v1559_v36 = vmul.f32 0.70710677, %v3582_v55  ;;  %2772 = verf.f32 %v1555_v20  ;;  %v1490_v40 = vrot.slane %v1458_v9, %v1461_v3  ;;  %v1511_v48 = vadd.f32 %v1486_v45, %v1280_v25 }
 0x33c   :  { %v1562_v33 = vmul.f32 0.70710677, %v3584_v29  ;;  %2774 = verf.f32 %v1556_v37  ;;  %v1563_v41 = vmul.f32 0.70710677, %v3586_v53  ;;  %v3593_v63 = vadd.f32 %v2338_v38, %v1505_v2 }
 0x33d   :  { %2776 = verf.f32 %v1557_v32  ;;  %v3595_v50 = vadd.f32 %v2338_v38, %v1506_v1  ;;  %v1512_v52 = vadd.f32 %v1486_v45, %v1283_v8  ;;  %v3597_v17 = vadd.f32 %v2338_v38, %v1509_v24 }
 0x33e   :  { %2778 = verf.f32 %v1558_v57  ;;  %v3599_v22 = vadd.f32 %v2338_v38, %v1510_v62  ;;  %v1560_v3 = vmul.f32 0.70710677, %v3593_v63  ;;  %v3604_v13 = vadd.f32 %v2338_v38, %v1511_v48 }
 0x33f   :  { %2780 = verf.f32 %v1559_v36  ;;  %v1561_v4 = vmul.f32 0.70710677, %v3595_v50  ;;  %v1564_v44 = vmul.f32 0.70710677, %v3597_v17  ;;  %v1513_v26 = vadd.f32 %v2560_v6, %v1490_v40 }
 0x340   :  { %2782 = verf.f32 %v1562_v33  ;;  %v1565_v10 = vmul.f32 0.70710677, %v3599_v22  ;;  %v3607_v5 = vadd.f32 %v2338_v38, %v1512_v52  ;;  %v1514_v47 = vadd.f32 %v2561_v59, %v1490_v40 }
 0x341   :  { %2784 = verf.f32 %v1563_v41  ;;  %v1566_v56 = vmul.f32 0.70710677, %v3604_v13  ;;  %v3611_v15 = vadd.f32 %v2338_v38, %v1513_v26  ;;  %v1538_v42 = vmul.f32 0.5, %v1522_v30 }
 0x342   :  { %2786 = verf.f32 %v1560_v3  ;;  %v1567_v60 = vmul.f32 0.70710677, %v3607_v5  ;;  %v3613_v31 = vadd.f32 %v2338_v38, %v1514_v47  ;;  %v1539_v18 = vmul.f32 0.5, %v1523_v27 }
 0x343   :  { %2788 = verf.f32 %v1561_v4  ;;  %v1540_v61 = vmul.f32 0.5, %v1524_v49  ;;  %v1568_v23 = vmul.f32 0.70710677, %v3611_v15  ;;  %v1541_v12 = vmul.f32 0.5, %v3578_v35 }
 0x344   :  { %2790 = verf.f32 %v1564_v44  ;;  %v1569_v38 = vmul.f32 0.70710677, %v3613_v31  ;;  %v1542_v58 = vmul.f32 0.5, %v3580_v21  ;;  %v1543_v27 = vmul.f32 0.5, %v3582_v55 }
 0x345   :  { %2792 = verf.f32 %v1565_v10  ;;  %v1544_v57 = vmul.f32 0.5, %v3593_v63  ;;  %v1545_v55 = vmul.f32 0.5, %v3595_v50  ;;  %v1546_v48 = vmul.f32 0.5, %v3584_v29 }
 0x346   :  { %2794 = verf.f32 %v1566_v56  ;;  %v1547_v33 = vmul.f32 0.5, %v3586_v53  ;;  %v1548_v29 = vmul.f32 0.5, %v3597_v17  ;;  %v1549_v53 = vmul.f32 0.5, %v3599_v22 }
 0x347   :  { %v2771_v11 = vpop.eup %2770  ;;  %2796 = verf.f32 %v1567_v60  ;;  %v1552_v17 = vmul.f32 0.5, %v3611_v15  ;;  %v1553_v22 = vmul.f32 0.5, %v3613_v31  ;;  %v2657_v15 = vld [vmem:[%s3867_s13] sm:$0xff]   ;;  %v20_v31 = vstv %s3868_s14 }
 0x348   :  { %v2773_v46 = vpop.eup %2772  ;;  %v1586_v6 = vadd.f32 1.0, %v2771_v11  ;;  %2798 = verf.f32 %v1568_v23  ;;  %v1550_v11 = vmul.f32 0.5, %v3604_v13  ;;  %21 = vst [vmem:[#allocation2] sm:$0x1] %v20_v31 }
 0x349   :  { %v2775_v7 = vpop.eup %2774  ;;  %v1587_v51 = vadd.f32 1.0, %v2773_v46  ;;  %2800 = verf.f32 %v1569_v38  ;;  %v1551_v46 = vmul.f32 0.5, %v3607_v5 }
 0x34a   :  { %v2777_v19 = vpop.eup %2776  ;;  %v1602_v14 = vmul.f32 %v1586_v6, %v1538_v42  ;;  %v1588_v54 = vadd.f32 1.0, %v2775_v7 }
 0x34b   :  { %v2779_v28 = vpop.eup %2778  ;;  %v1603_v34 = vmul.f32 %v1587_v51, %v1539_v18  ;;  %v1589_v43 = vadd.f32 1.0, %v2777_v19 }
 0x34c   :  { %v2781_v25 = vpop.eup %2780  ;;  %v1604_v0 = vmul.f32 %v1588_v54, %v1540_v61  ;;  %v1590_v9 = vadd.f32 1.0, %v2779_v28 }
 0x34d   :  { %v2783_v45 = vpop.eup %2782  ;;  %v1618_v2 = vpack.c.bf16 %v1603_v34, %v1602_v14  ;;  %v1605_v30 = vmul.f32 %v1589_v43, %v1541_v12  ;;  %v1591_v49 = vadd.f32 1.0, %v2781_v25  ;;  %v2656_v12 = vld [vmem:[%s3867_s13 + $0x8] sm:$0xff]   ;;  %v3650_v34 = vld [vmem:[%s3869_s12] ss:$0 sm:$0xff] }
 0x34e   :  { %v2785_v1 = vpop.eup %2784  ;;  %v1606_v16 = vmul.f32 %v1590_v9, %v1542_v58  ;;  %v1594_v62 = vadd.f32 1.0, %v2783_v45  ;;  %2598 = vmatprep.subr.bf16.mxu0 %v2656_v12  ;;  %2618 = vmatprep.subr.bf16.mxu1 %v2656_v12 }
 0x34f   :  { %v2787_v59 = vpop.eup %2786  ;;  %2582 = vmatprep.mubr.msk.bf16.mxu1 %vm924_vm2, %v1618_v2  ;;  %v1619_v35 = vpack.c.bf16 %v1605_v30, %v1604_v0  ;;  %v1607_v24 = vmul.f32 %v1591_v49, %v1543_v27  ;;  %v1595_v21 = vadd.f32 1.0, %v2785_v1  ;;  %2599 = vmatpush3.bf16.msra.mxu0 %v2656_v12 }
 0x350   :  { %v2789_v20 = vpop.eup %2788  ;;  %v1592_v37 = vadd.f32 1.0, %v2787_v59  ;;  %v1610_v4 = vmul.f32 %v1594_v62, %v1546_v48  ;;  %2600 = vmatprep.subr.bf16.mxu0 %v2657_v15 }
 0x351   :  { %2583 = vmatmul.mubr.msk.bf16.vlgmr.msra.gmra.mxu1 %vm924_vm2, %v1619_v35  ;;  %v1620_v32 = vpack.c.bf16 %v1607_v24, %v1606_v16  ;;  %v1593_v36 = vadd.f32 1.0, %v2789_v20  ;;  %v2791_v40 = vpop.eup %2790  ;;  %v1611_v44 = vmul.f32 %v1595_v21, %v1547_v33 }
 0x352   :  { %v2793_v8 = vpop.eup %2792  ;;  %v1608_v41 = vmul.f32 %v1592_v37, %v1544_v57  ;;  %v1596_v47 = vadd.f32 1.0, %v2791_v40  ;;  %2620 = vmatpush3.bf16.msra.mxu1 %v2656_v12 }
 0x353   :  { %2586 = vmatprep.mubr.msk.bf16.mxu1 %vm924_vm2, %v1620_v32  ;;  %v1609_v52 = vmul.f32 %v1593_v36, %v1545_v55  ;;  %v2795_v3 = vpop.eup %2794  ;;  %v1597_v63 = vadd.f32 1.0, %v2793_v8  ;;  %v1622_v56 = vpack.c.bf16 %v1611_v44, %v1610_v4  ;;  %2619 = vmatprep.subr.bf16.mxu1 %v2657_v15 }
 0x354   :  { %v2797_v26 = vpop.eup %2796  ;;  %v1598_v50 = vadd.f32 1.0, %v2795_v3  ;;  %v1612_v6 = vmul.f32 %v1596_v47, %v1548_v29  ;;  %2601 = vmatpush3.bf16.msra.mxu0 %v2657_v15 }
 0x355   :  { %v1621_v10 = vpack.c.bf16 %v1609_v52, %v1608_v41  ;;  %v1599_v60 = vadd.f32 1.0, %v2797_v26  ;;  %v2799_v42 = vpop.eup %2798  ;;  %v1613_v7 = vmul.f32 %v1597_v63, %v1549_v53 }
 0x356   :  { %v2801_v18 = vpop.eup %2800  ;;  %v1614_v51 = vmul.f32 %v1598_v50, %v1550_v11  ;;  %v1600_v14 = vadd.f32 1.0, %v2799_v42  ;;  %2621 = vmatpush3.bf16.msra.mxu1 %v2657_v15 }
 0x357   :  { %v1615_v19 = vmul.f32 %v1599_v60, %v1551_v46  ;;  %v1623_v61 = vpack.c.bf16 %v1613_v7, %v1612_v6  ;;  %v1601_v54 = vadd.f32 1.0, %v2801_v18 }
 0x358   :  { %v1616_v13 = vmul.f32 %v1600_v14, %v1552_v17 }
 0x359   :  { %2587 = vmatmul.mubr.msk.bf16.gmra.mxu1 %vm924_vm2, %v1621_v10  ;;  %v1624_v23 = vpack.c.bf16 %v1615_v19, %v1614_v51  ;;  %v1617_v5 = vmul.f32 %v1601_v54, %v1553_v22 }
 0x35a   :  { %2590 = vmatprep.mubr.msk.bf16.mxu1 %vm924_vm2, %v1622_v56 }
 0x35b   :  { %v1625_v28 = vpack.c.bf16 %v1617_v5, %v1616_v13 }
 0x361   :  { %2591 = vmatmul.mubr.msk.bf16.gmra.mxu1 %vm924_vm2, %v1623_v61 }
 0x362   :  { %2594 = vmatprep.mubr.msk.bf16.mxu1 %vm924_vm2, %v1624_v23 }
 0x369   :  { %2595 = vmatmul.mubr.msk.bf16.gmra.mxu1 %vm924_vm2, %v1625_v28 }
 0x411   :  { %v2584_v43 = vpop.f32.mrf.mxu1 }
 0x412   :  { %v1732_v38 = vadd.f32 %v2584_v43, %v3650_v34 }
 0x413   :  { %v1723_v25 = vpop.f32.mrf.mxu1 }
 0x414   :  { %v1724_v0 = vadd.f32 %v3650_v34, %v1723_v25  ;;  %v1804_v58 = vmul.f32 0.70710677, %v1732_v38  ;;  %v1788_v51 = vmul.f32 0.5, %v1732_v38 }
 0x415   :  { %v2585_v9 = vpop.f32.mrf.mxu1 }
 0x416   :  { %v1802_v45 = vmul.f32 0.70710677, %v1724_v0  ;;  %v1735_v2 = vadd.f32 %v2585_v9, %v3650_v34  ;;  %v1786_v10 = vmul.f32 0.5, %v1724_v0 }
 0x417   :  { %v1726_v30 = vpop.f32.mrf.mxu1 }
 0x418   :  { %2802 = verf.f32 %v1802_v45  ;;  %v1805_v27 = vmul.f32 0.70710677, %v1735_v2  ;;  %v1727_v49 = vadd.f32 %v3650_v34, %v1726_v30  ;;  %v1789_v11 = vmul.f32 0.5, %v1735_v2 }
 0x419   :  { %2804 = verf.f32 %v1804_v58  ;;  %v2588_v1 = vpop.f32.mrf.mxu1 }
 0x41a   :  { %2806 = verf.f32 %v1805_v27  ;;  %v1803_v16 = vmul.f32 0.70710677, %v1727_v49  ;;  %v3657_v59 = vadd.f32 %v2588_v1, %v3650_v34  ;;  %v1787_v6 = vmul.f32 0.5, %v1727_v49 }
 0x41b   :  { %v1739_v35 = vpop.f32.mrf.mxu1 }
 0x41c   :  { %2808 = verf.f32 %v1803_v16  ;;  %v3660_v24 = vadd.f32 %v3650_v34, %v1739_v35  ;;  %v1808_v20 = vmul.f32 0.70710677, %v3657_v59 }
 0x41d   :  { %v2589_v37 = vpop.f32.mrf.mxu1 }
 0x41e   :  { %v1806_v62 = vmul.f32 0.70710677, %v3660_v24  ;;  %v1751_v21 = vadd.f32 %v2589_v37, %v3650_v34  ;;  %v1790_v1 = vmul.f32 0.5, %v3660_v24 }
 0x41f   :  { %v1742_v32 = vpop.f32.mrf.mxu1 }
 0x420   :  { %2810 = verf.f32 %v1806_v62  ;;  %v1809_v57 = vmul.f32 0.70710677, %v1751_v21  ;;  %v3666_v55 = vadd.f32 %v3650_v34, %v1742_v32  ;;  %v1793_v27 = vmul.f32 0.5, %v1751_v21 }
 0x421   :  { %2812 = verf.f32 %v1808_v20  ;;  %v2592_v36 = vpop.f32.mrf.mxu1  ;;  %v1792_v20 = vmul.f32 0.5, %v3657_v59 }
 0x422   :  { %2814 = verf.f32 %v1809_v57  ;;  %v1807_v40 = vmul.f32 0.70710677, %v3666_v55  ;;  %v3670_v48 = vadd.f32 %v2592_v36, %v3650_v34  ;;  %v1791_v16 = vmul.f32 0.5, %v3666_v55 }
 0x423   :  { %v1755_v33 = vpop.f32.mrf.mxu1 }
 0x424   :  { %2816 = verf.f32 %v1807_v40  ;;  %v1812_v8 = vmul.f32 0.70710677, %v3670_v48  ;;  %v3674_v52 = vadd.f32 %v3650_v34, %v1755_v33 }
 0x425   :  { %v2803_v41 = vpop.eup %2802  ;;  %v2593_v3 = vpop.f32.mrf.mxu1 }
 0x426   :  { %v2805_v4 = vpop.eup %2804  ;;  %v3677_v44 = vadd.f32 %v2593_v3, %v3650_v34  ;;  %v1810_v47 = vmul.f32 0.70710677, %v3674_v52  ;;  %v1834_v56 = vadd.f32 1.0, %v2803_v41  ;;  %2818 = verf.f32 %v1812_v8 }
 0x427   :  { %v2807_v26 = vpop.eup %2806  ;;  %v1758_v63 = vpop.f32.mrf.mxu1  ;;  %v1836_v53 = vadd.f32 1.0, %v2805_v4  ;;  %v1794_v4 = vmul.f32 0.5, %v3674_v52 }
 0x428   :  { %v1837_v50 = vadd.f32 1.0, %v2807_v26  ;;  %v1813_v60 = vmul.f32 0.70710677, %v3677_v44  ;;  %2820 = verf.f32 %v1810_v47  ;;  %v1759_v46 = vadd.f32 %v3650_v34, %v1758_v63 }
 0x429   :  { %v2809_v29 = vpop.eup %2808  ;;  %v2596_v42 = vpop.f32.mrf.mxu1  ;;  %v1850_v54 = vmul.f32 %v1834_v56, %v1786_v10  ;;  %v1852_v22 = vmul.f32 %v1836_v53, %v1788_v51  ;;  %v1797_v59 = vmul.f32 0.5, %v3677_v44  ;;  %v1796_v47 = vmul.f32 0.5, %v3670_v48 }
 0x42a   :  { %v1835_v7 = vadd.f32 1.0, %v2809_v29  ;;  %2822 = verf.f32 %v1813_v60  ;;  %v3683_v18 = vadd.f32 %v2596_v42, %v3650_v34  ;;  %v1853_v19 = vmul.f32 %v1837_v50, %v1789_v11 }
 0x42b   :  { %v1811_v61 = vmul.f32 0.70710677, %v1759_v46  ;;  %v1771_v14 = vpop.f32.mrf.mxu1  ;;  %v1795_v26 = vmul.f32 0.5, %v1759_v46 }
 0x42c   :  { %v1851_v23 = vmul.f32 %v1835_v7, %v1787_v6  ;;  %v1816_v13 = vmul.f32 0.70710677, %v3683_v18  ;;  %v3687_v5 = vadd.f32 %v3650_v34, %v1771_v14  ;;  %v1867_v38 = vpack.c.bf16 %v1853_v19, %v1852_v22 }
 0x42d   :  { %v2811_v17 = vpop.eup %2810  ;;  %2824 = verf.f32 %v1811_v61  ;;  %v2597_v28 = vpop.f32.mrf.mxu1  ;;  %v1800_v14 = vmul.f32 0.5, %v3683_v18 }
 0x42e   :  { %v2813_v12 = vpop.eup %2812  ;;  %v1866_v15 = vpack.c.bf16 %v1851_v23, %v1850_v54  ;;  %v1783_v31 = vadd.f32 %v2597_v28, %v3650_v34  ;;  %v1814_v25 = vmul.f32 0.70710677, %v3687_v5  ;;  %v1838_v58 = vadd.f32 1.0, %v2811_v17 }
 0x42f   :  { %v2815_v43 = vpop.eup %2814  ;;  %v1774_v0 = vpop.f32.mrf.mxu1  ;;  %2826 = verf.f32 %v1816_v13  ;;  %v1840_v30 = vadd.f32 1.0, %v2813_v12  ;;  %v1798_v48 = vmul.f32 0.5, %v3687_v5  ;;  %v2352_v12 = vld [vmem:[#allocation2] ss:$0 sm:$0xff] }
 0x430   :  { %v1841_v9 = vadd.f32 1.0, %v2815_v43  ;;  %v1817_v45 = vmul.f32 0.70710677, %v1783_v31  ;;  %2602 = vmatprep.mubr.msk.bf16.mxu0 %vm1897_vm10, %v1866_v15  ;;  %2828 = verf.f32 %v1814_v25  ;;  %v1775_v49 = vadd.f32 %v3650_v34, %v1774_v0 }
 0x431   :  { %v2817_v2 = vpop.eup %2816  ;;  %2603 = vmatmul.mubr.msk.bf16.vlgmr.msra.gmra.mxu0 %vm1897_vm10, %v1867_v38  ;;  %v1854_v32 = vmul.f32 %v1838_v58, %v1790_v1  ;;  %v1856_v40 = vmul.f32 %v1840_v30, %v1792_v20  ;;  %v1801_v52 = vmul.f32 0.5, %v1783_v31 }
 0x432   :  { %v1839_v35 = vadd.f32 1.0, %v2817_v2  ;;  %2830 = verf.f32 %v1817_v45  ;;  %v1857_v37 = vmul.f32 %v1841_v9, %v1793_v27  ;;  %v1815_v62 = vmul.f32 0.70710677, %v1775_v49 }
 0x433   :  { %v2819_v36 = vpop.eup %2818  ;;  %v1799_v46 = vmul.f32 0.5, %v1775_v49 }
 0x434   :  { %v1855_v57 = vmul.f32 %v1839_v35, %v1791_v16  ;;  %2832 = verf.f32 %v1815_v62  ;;  %v1869_v8 = vpack.c.bf16 %v1857_v37, %v1856_v40  ;;  %v1844_v3 = vadd.f32 1.0, %v2819_v36 }
 0x435   :  { %v2821_v21 = vpop.eup %2820 }
 0x436   :  { %v1868_v33 = vpack.c.bf16 %v1855_v57, %v1854_v32  ;;  %v1842_v24 = vadd.f32 1.0, %v2821_v21  ;;  %v1860_v53 = vmul.f32 %v1844_v3, %v1796_v47  ;;  %v2020_v3 = vand.u32 127, %v1414_v39 }
 0x437   :  { %v2823_v34 = vpop.eup %2822 }
 0x438   :  { %v1845_v41 = vadd.f32 1.0, %v2823_v34  ;;  %2606 = vmatprep.mubr.msk.bf16.mxu0 %vm1897_vm10, %v1868_v33  ;;  %v1858_v50 = vmul.f32 %v1842_v24, %v1794_v4 }
 0x439   :  { %2607 = vmatmul.mubr.msk.bf16.gmra.mxu0 %vm1897_vm10, %v1869_v8 }
 0x43a   :  { %v2825_v55 = vpop.eup %2824  ;;  %v1861_v63 = vmul.f32 %v1845_v41, %v1797_v59  ;;  %v2021_v59 = vcvt.s32.f32 %v2020_v3 }
 0x43b   :  { %v1843_v10 = vadd.f32 1.0, %v2825_v55 }
 0x43c   :  { %v2827_v56 = vpop.eup %2826  ;;  %v1871_v6 = vpack.c.bf16 %v1861_v63, %v1860_v53  ;;  %v2022_v4 = vmul.f32 2.0, %v2021_v59 }
 0x43d   :  { %v1859_v60 = vmul.f32 %v1843_v10, %v1795_v26  ;;  %v2829_v29 = vpop.eup %2828  ;;  %v1848_v19 = vadd.f32 1.0, %v2827_v56 }
 0x43e   :  { %v1846_v51 = vadd.f32 1.0, %v2829_v29  ;;  %v3709_v26 = vadd.f32 -1.0, %v2022_v4 }
 0x43f   :  { %v2831_v11 = vpop.eup %2830  ;;  %v1870_v42 = vpack.c.bf16 %v1859_v60, %v1858_v50  ;;  %v1864_v22 = vmul.f32 %v1848_v19, %v1800_v14 }
 0x440   :  { %v1849_v7 = vadd.f32 1.0, %v2831_v11  ;;  %v1862_v23 = vmul.f32 %v1846_v51, %v1798_v48 }
 0x441   :  { %2610 = vmatprep.mubr.msk.bf16.mxu0 %vm1897_vm10, %v1870_v42  ;;  %v2833_v44 = vpop.eup %2832 }
 0x442   :  { %2611 = vmatmul.mubr.msk.bf16.gmra.mxu0 %vm1897_vm10, %v1871_v6  ;;  %v1847_v61 = vadd.f32 1.0, %v2833_v44  ;;  %v1865_v54 = vmul.f32 %v1849_v7, %v1801_v52 }
 0x444   :  { %v1863_v17 = vmul.f32 %v1847_v61, %v1799_v46  ;;  %v1873_v28 = vpack.c.bf16 %v1865_v54, %v1864_v22 }
 0x446   :  { %v1872_v13 = vpack.c.bf16 %v1863_v17, %v1862_v23 }
 0x448   :  { %2614 = vmatprep.mubr.msk.bf16.mxu1 %vm1897_vm10, %v1872_v13 }
 0x449   :  { %2615 = vmatmul.mubr.msk.bf16.vlgmr.msra.gmra.mxu1 %vm1897_vm10, %v1873_v28 }
 0x4f1   :  { %v2604_v15 = vpop.f32.mrf.mxu0 }
 0x4f2   :  { %v1965_v31 = vadd.f32 %v2604_v15, %v2352_v12 }
 0x4f3   :  { %v1956_v43 = vpop.f32.mrf.mxu0 }
 0x4f4   :  { %2036 = vperm.xlu1 %2627, %v1965_v31   ;;  %v1957_v38 = vadd.f32 %v2352_v12, %v1956_v43 }
 0x4f5   :  { %v2605_v5 = vpop.f32.mrf.mxu0 }
 0x4f6   :  { %v1968_v25 = vadd.f32 %v2605_v5, %v2352_v12 }
 0x4f7   :  { %v1959_v0 = vpop.f32.mrf.mxu0 }
 0x4f8   :  { %2041 = vperm.xlu0 %2626, %v1968_v25   ;;  %2026 = vperm.xlu1 %2627, %v1957_v38   ;;  %v1960_v58 = vadd.f32 %v2352_v12, %v1959_v0 }
 0x4f9   :  { %v2608_v18 = vpop.f32.mrf.mxu0 }
 0x4fa   :  { %v1981_v9 = vadd.f32 %v2608_v18, %v2352_v12 }
 0x4fb   :  { %v1972_v45 = vpop.f32.mrf.mxu0 }
 0x4fc   :  { %2031 = vperm.xlu0 %2626, %v1960_v58   ;;  %2056 = vperm.xlu1 %2627, %v1981_v9   ;;  %v1973_v30 = vadd.f32 %v2352_v12, %v1972_v45 }
 0x4fd   :  { %v2609_v2 = vpop.f32.mrf.mxu0 }
 0x4fe   :  { %v1984_v27 = vadd.f32 %v2609_v2, %v2352_v12 }
 0x4ff   :  { %v1975_v49 = vpop.f32.mrf.mxu0 }
 0x500   :  { %2061 = vperm.xlu0 %2626, %v1984_v27   ;;  %2046 = vperm.xlu1 %2627, %v1973_v30   ;;  %v1976_v1 = vadd.f32 %v2352_v12, %v1975_v49 }
 0x502   :  { %v2612_v16 = vpop.f32.mrf.mxu0 }
 0x503   :  { %v1997_v35 = vadd.f32 %v2612_v16, %v2352_v12 }
 0x504   :  { %v1988_v20 = vpop.f32.mrf.mxu0  ;;  %2051 = vperm.xlu0 %2626, %v1976_v1  }
 0x505   :  { %2076 = vperm.xlu1 %2627, %v1997_v35   ;;  %v1989_v62 = vadd.f32 %v2352_v12, %v1988_v20 }
 0x506   :  { %v2613_v37 = vpop.f32.mrf.mxu0 }
 0x507   :  { %v2000_v32 = vadd.f32 %v2613_v37, %v2352_v12 }
 0x508   :  { %v1991_v57 = vpop.f32.mrf.mxu0 }
 0x509   :  { %2081 = vperm.xlu0 %2626, %v2000_v32   ;;  %2066 = vperm.xlu1 %2627, %v1989_v62   ;;  %v2616_v36 = vpop.f32.mrf.mxu1  ;;  %v1992_v40 = vadd.f32 %v2352_v12, %v1991_v57 }
 0x50a   :  { %v2013_v41 = vadd.f32 %v2616_v36, %v2352_v12 }
 0x50b   :  { %v2004_v21 = vpop.f32.mrf.mxu1 }
 0x50c   :  { %v2005_v33 = vadd.f32 %v2352_v12, %v2004_v21 }
 0x50d   :  { %2071 = vperm.xlu0 %2626, %v1992_v40   ;;  %v2617_v34 = vpop.f32.mrf.mxu1 }
 0x50e   :  { %2086 = vperm.xlu1 %2627, %v2005_v33   ;;  %v2016_v55 = vadd.f32 %v2617_v34, %v2352_v12 }
 0x50f   :  { %v2007_v8 = vpop.f32.mrf.mxu1 }
 0x510   :  { %v2008_v24 = vadd.f32 %v2352_v12, %v2007_v8 }
 0x512   :  { %2091 = vperm.xlu0 %2626, %v2008_v24   ;;  %2096 = vperm.xlu1 %2627, %v2013_v41  }
 0x516   :  { %2101 = vperm.xlu0 %2626, %v2016_v55  }
 0x56f   :  { %v2037_v10 = vpop.permute.xlu1 %2036 }
 0x570   :  { %v3712_v47 = vmul.f32 %v3709_v26, %v2037_v10 }
 0x572   :  { %v2138_v63 = vand.u32 2147483647, %v3712_v47 }
 0x573   :  { %v2042_v56 = vpop.permute.xlu0 %2041  ;;  %v2027_v50 = vpop.permute.xlu1 %2026 }
 0x574   :  { %v2154_v60 = vsub.f32 0.0, %v2138_v63  ;;  %v3716_v29 = vmul.f32 %v3709_v26, %v2042_v56  ;;  %v3719_v53 = vmul.f32 %v3709_v26, %v2027_v50 }
 0x576   :  { %v2172_v39 = vmul.f32 1.442695, %v2154_v60  ;;  %v2139_v11 = vand.u32 2147483647, %v3716_v29  ;;  %v2136_v42 = vand.u32 2147483647, %v3719_v53 }
 0x577   :  { %v2032_v6 = vpop.permute.xlu0 %2031  ;;  %v2057_v7 = vpop.permute.xlu1 %2056 }
 0x578   :  { %2834 = vpow2.f32 %v2172_v39  ;;  %v2155_v51 = vsub.f32 0.0, %v2139_v11  ;;  %v3724_v44 = vmul.f32 %v3709_v26, %v2032_v6  ;;  %v3727_v19 = vmul.f32 %v3709_v26, %v2057_v7 }
 0x579   :  { %v2152_v52 = vsub.f32 0.0, %v2136_v42 }
 0x57a   :  { %v2174_v48 = vmul.f32 1.442695, %v2155_v51  ;;  %v2137_v46 = vand.u32 2147483647, %v3724_v44  ;;  %v2142_v14 = vand.u32 2147483647, %v3727_v19 }
 0x57b   :  { %v2168_v61 = vmul.f32 1.442695, %v2152_v52  ;;  %v2062_v54 = vpop.permute.xlu0 %2061  ;;  %v2047_v23 = vpop.permute.xlu1 %2046 }
 0x57c   :  { %2836 = vpow2.f32 %v2174_v48  ;;  %v2153_v17 = vsub.f32 0.0, %v2137_v46  ;;  %v3732_v22 = vmul.f32 %v3709_v26, %v2062_v54  ;;  %v3735_v13 = vmul.f32 %v3709_v26, %v2047_v23 }
 0x57d   :  { %2838 = vpow2.f32 %v2168_v61  ;;  %v2158_v28 = vsub.f32 0.0, %v2142_v14 }
 0x57e   :  { %v2170_v12 = vmul.f32 1.442695, %v2153_v17  ;;  %v2143_v15 = vand.u32 2147483647, %v3732_v22  ;;  %v2140_v43 = vand.u32 2147483647, %v3735_v13 }
 0x57f   :  { %v2180_v31 = vmul.f32 1.442695, %v2158_v28  ;;  %v2052_v5 = vpop.permute.xlu0 %2051 }
 0x580   :  { %2840 = vpow2.f32 %v2170_v12  ;;  %v2159_v38 = vsub.f32 0.0, %v2143_v15  ;;  %v3740_v25 = vmul.f32 %v3709_v26, %v2052_v5  ;;  %v2077_v0 = vpop.permute.xlu1 %2076  ;;  %v2156_v18 = vsub.f32 0.0, %v2140_v43 }
 0x581   :  { %2842 = vpow2.f32 %v2180_v31  ;;  %v3743_v58 = vmul.f32 %v3709_v26, %v2077_v0 }
 0x582   :  { %v2182_v9 = vmul.f32 1.442695, %v2159_v38  ;;  %v2141_v45 = vand.u32 2147483647, %v3740_v25  ;;  %v2176_v2 = vmul.f32 1.442695, %v2156_v18 }
 0x583   :  { %v2146_v30 = vand.u32 2147483647, %v3743_v58 }
 0x584   :  { %2844 = vpow2.f32 %v2182_v9  ;;  %v2157_v27 = vsub.f32 0.0, %v2141_v45  ;;  %v2082_v49 = vpop.permute.xlu0 %2081  ;;  %v2067_v1 = vpop.permute.xlu1 %2066  ;;  %v2122_v45 = vmax.f32 %v3712_v47, 0.0 }
 0x585   :  { %v2835_v16 = vpop.eup %2834  ;;  %2846 = vpow2.f32 %v2176_v2  ;;  %v2162_v35 = vsub.f32 0.0, %v2146_v30  ;;  %v3748_v20 = vmul.f32 %v3709_v26, %v2082_v49  ;;  %v3751_v37 = vmul.f32 %v3709_v26, %v2067_v1 }
 0x586   :  { %v2202_v62 = vadd.f32 1.0, %v2835_v16  ;;  %v2178_v32 = vmul.f32 1.442695, %v2157_v27 }
 0x587   :  { %v2188_v57 = vmul.f32 1.442695, %v2162_v35  ;;  %v2147_v36 = vand.u32 2147483647, %v3748_v20  ;;  %v2144_v40 = vand.u32 2147483647, %v3751_v37 }
 0x588   :  { %2848 = vlog2.f32 %v2202_v62  ;;  %v2072_v21 = vpop.permute.xlu0 %2071 }
 0x589   :  { %v2837_v33 = vpop.eup %2836  ;;  %2850 = vpow2.f32 %v2178_v32  ;;  %v2163_v34 = vsub.f32 0.0, %v2147_v36  ;;  %v3756_v8 = vmul.f32 %v3709_v26, %v2072_v21  ;;  %v2160_v55 = vsub.f32 0.0, %v2144_v40  ;;  %v2087_v3 = vpop.permute.xlu1 %2086 }
 0x58a   :  { %v2839_v41 = vpop.eup %2838  ;;  %v2203_v24 = vadd.f32 1.0, %v2837_v33  ;;  %2852 = vpow2.f32 %v2188_v57  ;;  %v3760_v56 = vmul.f32 %v3709_v26, %v2087_v3  ;;  %v2123_v32 = vmax.f32 %v3716_v29, 0.0 }
 0x58b   :  { %v2200_v59 = vadd.f32 1.0, %v2839_v41  ;;  %v2190_v4 = vmul.f32 1.442695, %v2163_v34  ;;  %v2145_v10 = vand.u32 2147483647, %v3756_v8  ;;  %v2120_v33 = vmax.f32 %v3719_v53, 0.0 }
 0x58c   :  { %2854 = vlog2.f32 %v2203_v24  ;;  %v2184_v63 = vmul.f32 1.442695, %v2160_v55  ;;  %v2148_v42 = vand.u32 2147483647, %v3760_v56 }
 0x58d   :  { %v2841_v50 = vpop.eup %2840  ;;  %2856 = vlog2.f32 %v2200_v59  ;;  %v2161_v60 = vsub.f32 0.0, %v2145_v10  ;;  %v2092_v6 = vpop.permute.xlu0 %2091 }
 0x58e   :  { %v2843_v39 = vpop.eup %2842  ;;  %v2201_v11 = vadd.f32 1.0, %v2841_v50  ;;  %2858 = vpow2.f32 %v2190_v4  ;;  %v2097_v7 = vpop.permute.xlu1 %2096  ;;  %v3764_v48 = vmul.f32 %v3709_v26, %v2092_v6  ;;  %v2164_v46 = vsub.f32 0.0, %v2148_v42 }
 0x58f   :  { %v2206_v51 = vadd.f32 1.0, %v2843_v39  ;;  %2860 = vpow2.f32 %v2184_v63  ;;  %v2186_v52 = vmul.f32 1.442695, %v2161_v60  ;;  %v3767_v61 = vmul.f32 %v3709_v26, %v2097_v7 }
 0x590   :  { %2862 = vlog2.f32 %v2201_v11  ;;  %v2149_v54 = vand.u32 2147483647, %v3764_v48  ;;  %v2192_v28 = vmul.f32 1.442695, %v2164_v46  ;;  %v2121_v63 = vmax.f32 %v3724_v44, 0.0 }
 0x591   :  { %v2845_v14 = vpop.eup %2844  ;;  %2864 = vlog2.f32 %v2206_v51  ;;  %v2102_v12 = vpop.permute.xlu0 %2101  ;;  %v2150_v43 = vand.u32 2147483647, %v3767_v61  ;;  %v2126_v39 = vmax.f32 %v3727_v19, 0.0  ;;  %v2127_v19 = vmax.f32 %v3732_v22, 0.0 }
 0x592   :  { %v2847_v23 = vpop.eup %2846  ;;  %v2207_v17 = vadd.f32 1.0, %v2845_v14  ;;  %2866 = vpow2.f32 %v2186_v52  ;;  %v2165_v31 = vsub.f32 0.0, %v2149_v54  ;;  %v3772_v5 = vmul.f32 %v3709_v26, %v2102_v12 }
 0x593   :  { %v2204_v15 = vadd.f32 1.0, %v2847_v23  ;;  %v2166_v18 = vsub.f32 0.0, %v2150_v43  ;;  %v2124_v23 = vmax.f32 %v3735_v13, 0.0 }
 0x594   :  { %2868 = vlog2.f32 %v2207_v17  ;;  %v2194_v0 = vmul.f32 1.442695, %v2165_v31  ;;  %v2151_v30 = vand.u32 2147483647, %v3772_v5 }
 0x595   :  { %v2849_v38 = vpop.eup %2848  ;;  %2870 = vlog2.f32 %v2204_v15  ;;  %v2196_v1 = vmul.f32 1.442695, %v2166_v18  ;;  %v2125_v18 = vmax.f32 %v3740_v25, 0.0 }
 0x596   :  { %v2851_v9 = vpop.eup %2850  ;;  %v2221_v2 = vmul.f32 0.6931472, %v2849_v38  ;;  %2872 = vpow2.f32 %v2192_v28  ;;  %v2167_v26 = vsub.f32 0.0, %v2151_v30 }
 0x597   :  { %v2853_v27 = vpop.eup %2852  ;;  %v2205_v49 = vadd.f32 1.0, %v2851_v9  ;;  %2874 = vpow2.f32 %v2194_v0 }
 0x598   :  { %v2250_v16 = vadd.f32 %v2221_v2, %v2122_v45  ;;  %v2210_v35 = vadd.f32 1.0, %v2853_v27  ;;  %v2198_v47 = vmul.f32 1.442695, %v2167_v26  ;;  %v2130_v2 = vmax.f32 %v3743_v58, 0.0 }
 0x599   :  { %v2855_v62 = vpop.eup %2854  ;;  %2876 = vlog2.f32 %v2205_v49  ;;  %v2128_v58 = vmax.f32 %v3751_v37, 0.0 }
 0x59a   :  { %v2857_v57 = vpop.eup %2856  ;;  %v2266_v36 = vsub.f32 0.0, %v2250_v16  ;;  %v2223_v40 = vmul.f32 0.6931472, %v2855_v62  ;;  %2878 = vlog2.f32 %v2210_v35 }
 0x59b   :  { %v2859_v21 = vpop.eup %2858  ;;  %v2217_v34 = vmul.f32 0.6931472, %v2857_v57  ;;  %2880 = vpow2.f32 %v2196_v1  ;;  %v2131_v57 = vmax.f32 %v3748_v20, 0.0  ;;  %v2129_v20 = vmax.f32 %v3756_v8, 0.0 }
 0x59c   :  { %v2861_v41 = vpop.eup %2860  ;;  %2283 = vst.msk [vmem:[%s3870_s15 + $0x10] sm:$0xff] %vm2280_vm11, %v2266_v36  ;;  %v2251_v24 = vadd.f32 %v2223_v40, %v2123_v32  ;;  %v2211_v55 = vadd.f32 1.0, %v2859_v21  ;;  %2882 = vpow2.f32 %v2198_v47  ;;  %v2133_v8 = vmax.f32 %v3764_v48, 0.0 }
 0x59d   :  { %v2863_v29 = vpop.eup %2862  ;;  %v2248_v3 = vadd.f32 %v2217_v34, %v2120_v33  ;;  %v2208_v59 = vadd.f32 1.0, %v2861_v41 }
 0x59e   :  { %v2865_v4 = vpop.eup %2864  ;;  %v2267_v10 = vsub.f32 0.0, %v2251_v24  ;;  %v2219_v50 = vmul.f32 0.6931472, %v2863_v29  ;;  %2884 = vlog2.f32 %v2211_v55 }
 0x59f   :  { %v2867_v53 = vpop.eup %2866  ;;  %v2264_v60 = vsub.f32 0.0, %v2248_v3  ;;  %v2229_v11 = vmul.f32 0.6931472, %v2865_v4  ;;  %2886 = vlog2.f32 %v2208_v59  ;;  %v2132_v59 = vmax.f32 %v3760_v56, 0.0 }
 0x5a0   :  { %2284 = vst.msk [vmem:[%s3870_s15 + $0x18] sm:$0xff] %vm2280_vm11, %v2267_v10  ;;  %v2249_v42 = vadd.f32 %v2219_v50, %v2121_v63  ;;  %v2209_v6 = vadd.f32 1.0, %v2867_v53  ;;  %v2135_v56 = vmax.f32 %v3772_v5, 0.0 }
 0x5a1   :  { %v2869_v7 = vpop.eup %2868  ;;  %2281 = vst.msk [vmem:[%s3870_s15] sm:$0xff] %vm2280_vm11, %v2264_v60  ;;  %v2254_v44 = vadd.f32 %v2229_v11, %v2126_v39 }
 0x5a2   :  { %v2871_v51 = vpop.eup %2870  ;;  %v2265_v52 = vsub.f32 0.0, %v2249_v42  ;;  %v2231_v46 = vmul.f32 0.6931472, %v2869_v7  ;;  %2888 = vlog2.f32 %v2209_v6  ;;  %v2134_v42 = vmax.f32 %v3767_v61, 0.0 }
 0x5a3   :  { %v2873_v14 = vpop.eup %2872  ;;  %v2270_v54 = vsub.f32 0.0, %v2254_v44  ;;  %v2225_v17 = vmul.f32 0.6931472, %v2871_v51 }
 0x5a4   :  { %v2875_v28 = vpop.eup %2874  ;;  %2282 = vst.msk [vmem:[%s3870_s15 + $0x8] sm:$0xff] %vm2280_vm11, %v2265_v52  ;;  %v2255_v12 = vadd.f32 %v2231_v46, %v2127_v19  ;;  %v2212_v15 = vadd.f32 1.0, %v2873_v14 }
 0x5a5   :  { %2287 = vst.msk [vmem:[%s3870_s15 + $0x30] sm:$0xff] %vm2280_vm11, %v2270_v54  ;;  %v2252_v22 = vadd.f32 %v2225_v17, %v2124_v23  ;;  %v2213_v31 = vadd.f32 1.0, %v2875_v28 }
 0x5a6   :  { %v2877_v43 = vpop.eup %2876  ;;  %v2271_v38 = vsub.f32 0.0, %v2255_v12  ;;  %2890 = vlog2.f32 %v2212_v15 }
 0x5a7   :  { %v2879_v13 = vpop.eup %2878  ;;  %v2268_v0 = vsub.f32 0.0, %v2252_v22  ;;  %v2227_v9 = vmul.f32 0.6931472, %v2877_v43  ;;  %2892 = vlog2.f32 %v2213_v31 }
 0x5a8   :  { %v2881_v45 = vpop.eup %2880  ;;  %2288 = vst.msk [vmem:[%s3870_s15 + $0x38] sm:$0xff] %vm2280_vm11, %v2271_v38  ;;  %v2237_v30 = vmul.f32 0.6931472, %v2879_v13 }
 0x5a9   :  { %v2883_v27 = vpop.eup %2882  ;;  %2285 = vst.msk [vmem:[%s3870_s15 + $0x20] sm:$0xff] %vm2280_vm11, %v2268_v0  ;;  %v2253_v49 = vadd.f32 %v2227_v9, %v2125_v18  ;;  %v2214_v1 = vadd.f32 1.0, %v2881_v45 }
 0x5aa   :  { %v2258_v25 = vadd.f32 %v2237_v30, %v2130_v2  ;;  %v2215_v16 = vadd.f32 1.0, %v2883_v27 }
 0x5ab   :  { %v2885_v35 = vpop.eup %2884  ;;  %v2269_v26 = vsub.f32 0.0, %v2253_v49  ;;  %2894 = vlog2.f32 %v2214_v1 }
 0x5ac   :  { %v2887_v62 = vpop.eup %2886  ;;  %v2274_v32 = vsub.f32 0.0, %v2258_v25  ;;  %v2239_v36 = vmul.f32 0.6931472, %v2885_v35  ;;  %2896 = vlog2.f32 %v2215_v16 }
 0x5ad   :  { %2286 = vst.msk [vmem:[%s3870_s15 + $0x28] sm:$0xff] %vm2280_vm11, %v2269_v26  ;;  %v2233_v40 = vmul.f32 0.6931472, %v2887_v62 }
 0x5ae   :  { %2291 = vst.msk [vmem:[%s3870_s15 + $0x50] sm:$0xff] %vm2280_vm11, %v2274_v32  ;;  %v2259_v47 = vadd.f32 %v2239_v36, %v2131_v57 }
 0x5af   :  { %v2889_v21 = vpop.eup %2888  ;;  %v2256_v33 = vadd.f32 %v2233_v40, %v2128_v58 }
 0x5b0   :  { %v2275_v34 = vsub.f32 0.0, %v2259_v47  ;;  %v2235_v41 = vmul.f32 0.6931472, %v2889_v21 }
 0x5b1   :  { %v2272_v24 = vsub.f32 0.0, %v2256_v33 }
 0x5b2   :  { %2292 = vst.msk [vmem:[%s3870_s15 + $0x58] sm:$0xff] %vm2280_vm11, %v2275_v34  ;;  %v2257_v37 = vadd.f32 %v2235_v41, %v2129_v20 }
 0x5b3   :  { %v2891_v55 = vpop.eup %2890  ;;  %2289 = vst.msk [vmem:[%s3870_s15 + $0x40] sm:$0xff] %vm2280_vm11, %v2272_v24 }
 0x5b4   :  { %v2893_v29 = vpop.eup %2892  ;;  %v2273_v3 = vsub.f32 0.0, %v2257_v37  ;;  %v2241_v4 = vmul.f32 0.6931472, %v2891_v55 }
 0x5b5   :  { %v2243_v10 = vmul.f32 0.6931472, %v2893_v29 }
 0x5b6   :  { %2290 = vst.msk [vmem:[%s3870_s15 + $0x48] sm:$0xff] %vm2280_vm11, %v2273_v3  ;;  %v2260_v63 = vadd.f32 %v2241_v4, %v2132_v59 }
 0x5b7   :  { %v2261_v50 = vadd.f32 %v2243_v10, %v2133_v8 }
 0x5b8   :  { %v2895_v53 = vpop.eup %2894  ;;  %v2276_v60 = vsub.f32 0.0, %v2260_v63 }
 0x5b9   :  { %v2897_v39 = vpop.eup %2896  ;;  %v2277_v11 = vsub.f32 0.0, %v2261_v50  ;;  %v2245_v6 = vmul.f32 0.6931472, %v2895_v53 }
 0x5ba   :  { %2293 = vst.msk [vmem:[%s3870_s15 + $0x60] sm:$0xff] %vm2280_vm11, %v2276_v60  ;;  %v2247_v48 = vmul.f32 0.6931472, %v2897_v39 }
 0x5bb   :  { %2294 = vst.msk [vmem:[%s3870_s15 + $0x68] sm:$0xff] %vm2280_vm11, %v2277_v11  ;;  %v2262_v7 = vadd.f32 %v2245_v6, %v2134_v42 }
 0x5bc   :  { %v2263_v44 = vadd.f32 %v2247_v48, %v2135_v56 }
 0x5bd   :  { %v2278_v51 = vsub.f32 0.0, %v2262_v7 }
 0x5be   :  { %v2279_v52 = vsub.f32 0.0, %v2263_v44 }
 0x5bf   :  { %2295 = vst.msk [vmem:[%s3870_s15 + $0x70] sm:$0xff] %vm2280_vm11, %v2278_v51 }
 0x5c0   :  { %2296 = vst.msk [vmem:[%s3870_s15 + $0x78] sm:$0xff] %vm2280_vm11, %v2279_v52 }

</bundles_post_ra>
